<compile_context>
chip_gen: v7x
topology: tpu7x:2x2x1
jax: 0.10.0
libtpu: 0.0.40
codegen_flags: <defaults>
</compile_context>

<pallas_src>
import functools

import numpy as np

import jax
import jax.numpy as jnp
from jax import lax
from jax.experimental import pallas as pl
from jax.experimental.pallas import tpu as pltpu


# ----------------------------------------------------------------------------
# Fused kernel: conv3x3 + bias + ReLU  ->  single-head self-attention
# One grid step processes BC images; conv/projections run feature-major over the
# lane-concatenated (D, BC*S) activations, attention runs per image / per q-tile.
# ----------------------------------------------------------------------------
def _full_net_kernel(x_ref, pmask_ref, w36_ref, bc_ref, wqkv_ref, bqkv_ref,
                     wo_ref, bo_ref, o_ref, stack_ref, *, width, q_tile):
    BC, S, D = o_ref.shape             # images/step, seq len (=H*W), model dim
    C = x_ref.shape[1]                 # conv input channels
    halo = width + 1
    nq = S // q_tile

    # ---- encoder: build stacked im2col operand (9*C, BC*S) in VMEM -----------
    # Every 3x3 tap is a static contiguous lane slice of the halo-padded row;
    # the dx!=0 column masks are applied once per dx on the full padded row.
    for b in range(BC):
        x32 = x_ref[b].astype(jnp.float32)              # (C, Sp)
        x_m = x32 * pmask_ref[0:1, :]                   # dx = -1 masked copy
        x_p = x32 * pmask_ref[1:2, :]                   # dx = +1 masked copy
        for dy in (-1, 0, 1):
            for dx in (-1, 0, 1):
                t = (dy + 1) * 3 + (dx + 1)             # PyTorch (ky, kx) tap order
                start = halo + dy * width + dx          # static offset in padded row
                src = x_m if dx < 0 else (x_p if dx > 0 else x32)
                stack_ref[t * C:(t + 1) * C, b * S:(b + 1) * S] = src[:, start:start + S]

    # single K = 9*C MXU pass for the whole conv (all BC images at once)
    stacked = stack_ref[...].astype(jnp.bfloat16)       # (9*C, BC*S)
    h = jnp.dot(w36_ref[...], stacked, preferred_element_type=jnp.float32)
    h = jnp.maximum(h + bc_ref[...], 0.0).astype(jnp.bfloat16)          # (D, BC*S)

    # ---- decoder: fused QKV projection (1/sqrt(D) pre-folded into Wq/bq) -----
    qkv = jnp.dot(wqkv_ref[...], h,
                  preferred_element_type=jnp.float32) + bqkv_ref[...]   # (3D, BC*S)

    wo_bf = wo_ref[...]                                  # (D, D) bf16
    bo = bo_ref[...]                                     # (1, D) f32

    for b in range(BC):
        k_img = qkv[D:2 * D, b * S:(b + 1) * S].astype(jnp.bfloat16)      # (D, S)
        v_img = qkv[2 * D:3 * D, b * S:(b + 1) * S].astype(jnp.bfloat16)  # (D, S)
        # one small (D,S)->(S,D) transpose per image (f32 transpose kept: known-good
        # lowering; the bf16-before-transpose micro-win is negligible at this size)
        q_t = jnp.transpose(qkv[0:D, b * S:(b + 1) * S]).astype(jnp.bfloat16)  # (S, D)

        # query-tiled softmax + PV: never materialize a full (S,S) intermediate
        for qb in range(nq):
            q_blk = q_t[qb * q_tile:(qb + 1) * q_tile, :]                  # (TQ, D)
            s_blk = jnp.dot(q_blk, k_img,
                            preferred_element_type=jnp.float32)            # (TQ, S)
            m = jnp.max(s_blk, axis=-1, keepdims=True)
            e = jnp.exp(s_blk - m)
            denom = jnp.sum(e, axis=-1, keepdims=True)
            # approx reciprocal (EUP slot): rows sum to 1 within ~1e-3 (inference OK)
            p = (e * pl.reciprocal(denom, approx=True)).astype(jnp.bfloat16)
            # NT dot_generals: big p stays un-transposed; only small RHS is NT.
            ctx = lax.dot_general(p, v_img, (((1,), (1,)), ((), ())),
                                  preferred_element_type=jnp.float32)      # (TQ, D)
            out_blk = lax.dot_general(ctx.astype(jnp.bfloat16), wo_bf,
                                      (((1,), (1,)), ((), ())),
                                      preferred_element_type=jnp.float32) + bo
            o_ref[b, qb * q_tile:(qb + 1) * q_tile, :] = out_blk.astype(o_ref.dtype)


# ----------------------------------------------------------------------------
# One-time parameter preprocessing (hoisted out of the per-call forward path)
# ----------------------------------------------------------------------------
def preprocess_params(params, *, height, width):
    conv_w = params["conv_w"]                            # (Cout, C, 3, 3)
    c_out, c_in = conv_w.shape[0], conv_w.shape[1]
    D = c_out
    S = height * width
    Sp = S + 2 * (width + 1)

    # (Cout, C, 3, 3) -> (Cout, 9*C); columns ordered (tap, channel), tap=(dy+1)*3+(dx+1)
    w36 = jnp.transpose(conv_w, (0, 2, 3, 1)).reshape(c_out, 9 * c_in).astype(jnp.bfloat16)
    b_conv = params["conv_b"].reshape(c_out, 1).astype(jnp.float32)

    # fused QKV in PyTorch (out,in) convention; fold softmax 1/sqrt(D) into Wq/bq
    scale = 1.0 / float(D) ** 0.5
    wqkv = jnp.concatenate([params["wq"] * scale, params["wk"], params["wv"]],
                           axis=0).astype(jnp.bfloat16)                    # (3D, D)
    bqkv = jnp.concatenate([params["bq"] * scale, params["bk"], params["bv"]],
                           axis=0).reshape(3 * D, 1).astype(jnp.float32)
    wo = params["wo"].astype(jnp.bfloat16)
    bo = params["bo"].reshape(1, D).astype(jnp.float32)

    # column-validity masks over the halo-padded flattened row, one per dx != 0
    # (shared by all dy): dx=-1 -> p % W != 0 ; dx=+1 -> p % W != 1
    pcol = np.arange(Sp) % width
    pmask = jnp.asarray(np.stack([pcol != 0, pcol != 1], axis=0).astype(np.float32))

    return dict(w36=w36, b_conv=b_conv, wqkv=wqkv, bqkv=bqkv, wo=wo, bo=bo, pmask=pmask)


# ----------------------------------------------------------------------------
# Wrapper: layout plumbing only (pad/cast input, call the fused kernel)
# ----------------------------------------------------------------------------
def full_net_forward(x_nchw, prepped, *, images_per_step=None, q_tile=64):
    B, C, H, W = x_nchw.shape
    S = H * W
    Sp = S + 2 * (W + 1)
    D = prepped["wo"].shape[0]
    assert prepped["pmask"].shape[1] == Sp

    # >= 2 grid steps whenever possible so both v7x TensorCores are used
    # ("parallel" axis); each step batches BC images along the lane axis.
    if images_per_step is None:
        images_per_step = B // 2 if (B >= 2 and B % 2 == 0) else 1
    BC = images_per_step
    if B % BC != 0:
        raise ValueError(f"batch {B} not divisible by images_per_step {BC}")
    G = B // BC

    q_tile = min(q_tile, S)
    assert S % q_tile == 0

    # 1x-traffic bf16 input: flatten spatial, zero halo of (W+1) on each side so
    # every 3x3 tap becomes a static contiguous lane slice inside the kernel.
    x_lin = jnp.pad(x_nchw.astype(jnp.bfloat16).reshape(B, C, S),
                    ((0, 0), (0, 0), (W + 1, W + 1)))

    kernel = functools.partial(_full_net_kernel, width=W, q_tile=q_tile)

    return pl.pallas_call(
        kernel,
        out_shape=jax.ShapeDtypeStruct((B, S, D), jnp.float32),
        grid=(G,),
        in_specs=[
            pl.BlockSpec((BC, C, Sp), lambda g: (g, 0, 0)),      # halo'd bf16 input
            pl.BlockSpec((2, Sp), lambda g: (0, 0)),             # per-dx column masks
            pl.BlockSpec((D, 9 * C), lambda g: (0, 0)),          # stacked conv weights
            pl.BlockSpec((D, 1), lambda g: (0, 0)),              # conv bias
            pl.BlockSpec((3 * D, D), lambda g: (0, 0)),          # fused Wqkv (q pre-scaled)
            pl.BlockSpec((3 * D, 1), lambda g: (0, 0)),          # fused bqkv
            pl.BlockSpec((D, D), lambda g: (0, 0)),              # Wo
            pl.BlockSpec((1, D), lambda g: (0, 0)),              # bo
        ],
        out_specs=pl.BlockSpec((BC, S, D), lambda g: (g, 0, 0)),  # direct (B,S,D) store
        scratch_shapes=[pltpu.VMEM((9 * C, BC * S), jnp.float32)],
        compiler_params=pltpu.CompilerParams(
            dimension_semantics=("parallel",)),
    )(x_lin, prepped["pmask"], prepped["w36"], prepped["b_conv"],
      prepped["wqkv"], prepped["bqkv"], prepped["wo"], prepped["bo"])


# ----------------------------------------------------------------------------
# Pure-JAX reference (f32) for correctness checking
# ----------------------------------------------------------------------------
def full_net_reference(x_nchw, params):
    h = lax.conv_general_dilated(
        x_nchw, params["conv_w"], window_strides=(1, 1), padding="SAME",
        dimension_numbers=("NCHW", "OIHW", "NCHW"))
    h = jax.nn.relu(h + params["conv_b"][None, :, None, None])
    B, D, H, W = h.shape
    hs = jnp.transpose(h.reshape(B, D, H * W), (0, 2, 1))       # (B, S, D)
    q = hs @ params["wq"].T + params["bq"]
    k = hs @ params["wk"].T + params["bk"]
    v = hs @ params["wv"].T + params["bv"]
    s = jnp.einsum("bqd,bkd->bqk", q, k) / jnp.sqrt(jnp.float32(D))
    p = jax.nn.softmax(s, axis=-1)
    ctx = jnp.einsum("bqk,bkd->bqd", p, v)
    return ctx @ params["wo"].T + params["bo"]


def init_params(key, c_in=4, c_out=32):
    keys = jax.random.split(key, 9)
    scale_conv = 1.0 / jnp.sqrt(jnp.float32(c_in * 9))
    scale_lin = 1.0 / jnp.sqrt(jnp.float32(c_out))
    return {
        "conv_w": jax.random.normal(keys[0], (c_out, c_in, 3, 3), jnp.float32) * scale_conv,
        "conv_b": jax.random.normal(keys[1], (c_out,), jnp.float32) * 0.01,
        "wq": jax.random.normal(keys[2], (c_out, c_out), jnp.float32) * scale_lin,
        "wk": jax.random.normal(keys[3], (c_out, c_out), jnp.float32) * scale_lin,
        "wv": jax.random.normal(keys[4], (c_out, c_out), jnp.float32) * scale_lin,
        "wo": jax.random.normal(keys[5], (c_out, c_out), jnp.float32) * scale_lin,
        "bq": jax.random.normal(keys[6], (c_out,), jnp.float32) * 0.01,
        "bk": jax.random.normal(keys[7], (c_out,), jnp.float32) * 0.01,
        "bv": jax.random.normal(keys[8], (c_out,), jnp.float32) * 0.01,
        "bo": jnp.zeros((c_out,), jnp.float32),
    }


if __name__ == "__main__":
    key = jax.random.PRNGKey(0)
    k_x, k_p = jax.random.split(key)

    C, H, W, C_OUT = 4, 16, 16, 32
    params = init_params(k_p, c_in=C, c_out=C_OUT)
    prepped = preprocess_params(params, height=H, width=W)   # hoisted: computed once

    fwd = jax.jit(full_net_forward)

    # B=2 -> 1 image/step, B=4 -> 2 images/step; both use 2 parallel grid steps.
    for B in (2, 4):
        x = jax.random.normal(jax.random.fold_in(k_x, B), (B, C, H, W), jnp.float32)
        y = fwd(x, prepped)
        jax.block_until_ready(y)

        assert y.shape == (B, H * W, C_OUT), y.shape
        assert bool(jnp.all(jnp.isfinite(y)))

        # tightened tolerance (bf16 MXU operands / f32 accumulation, approx reciprocal)
        y_ref = full_net_reference(x, params)
        err = float(jnp.max(jnp.abs(y - y_ref)))
        assert err < 0.15, f"B={B}: max abs error vs f32 reference: {err}"

    print("KERNEL_OK")
</pallas_src>

<mosaic_0001>
module attributes {stable_mosaic.version = 11 : i64} {
  func.func @_full_net_kernel(%arg0: i32, %arg1: memref<1x4x290xbf16, #tpu.memory_space<vmem>>, %arg2: memref<2x290xf32, #tpu.memory_space<vmem>>, %arg3: memref<32x36xbf16, #tpu.memory_space<vmem>>, %arg4: memref<32x1xf32, #tpu.memory_space<vmem>>, %arg5: memref<96x32xbf16, #tpu.memory_space<vmem>>, %arg6: memref<96x1xf32, #tpu.memory_space<vmem>>, %arg7: memref<32x32xbf16, #tpu.memory_space<vmem>>, %arg8: memref<1x32xf32, #tpu.memory_space<vmem>>, %arg9: memref<1x256x32xf32, #tpu.memory_space<vmem>>, %arg10: memref<36x256xf32, #tpu.memory_space<vmem>>) attributes {dimension_semantics = [#tpu.dimension_semantics<parallel>], iteration_bounds = array<i64: 2>, scalar_prefetch = 0 : i64, scratch_operands = 1 : i64, tpu.core_type = #tpu.core_type<tc>, window_params = [{transform_indices = @transform_0, window_bounds = array<i64: 1, 4, 290>}, {pipeline_mode = #tpu.pipeline_mode<synchronous>, transform_indices = @transform_1, window_bounds = array<i64: 2, 290>}, {pipeline_mode = #tpu.pipeline_mode<synchronous>, transform_indices = @transform_2, window_bounds = array<i64: 32, 36>}, {pipeline_mode = #tpu.pipeline_mode<synchronous>, transform_indices = @transform_3, window_bounds = array<i64: 32, 1>}, {pipeline_mode = #tpu.pipeline_mode<synchronous>, transform_indices = @transform_4, window_bounds = array<i64: 96, 32>}, {pipeline_mode = #tpu.pipeline_mode<synchronous>, transform_indices = @transform_5, window_bounds = array<i64: 96, 1>}, {pipeline_mode = #tpu.pipeline_mode<synchronous>, transform_indices = @transform_6, window_bounds = array<i64: 32, 32>}, {pipeline_mode = #tpu.pipeline_mode<synchronous>, transform_indices = @transform_7, window_bounds = array<i64: 1, 32>}, {transform_indices = @transform_8, window_bounds = array<i64: 1, 256, 32>}]} {
    %c0 = arith.constant 0 : index
    %c0_0 = arith.constant 0 : index
    %c0_1 = arith.constant 0 : index
    %0 = vector.load %arg1[%c0, %c0_0, %c0_1] : memref<1x4x290xbf16, #tpu.memory_space<vmem>>, vector<1x4x290xbf16>
    %1 = vector.shape_cast %0 : vector<1x4x290xbf16> to vector<4x290xbf16>
    %2 = arith.extf %1 : vector<4x290xbf16> to vector<4x290xf32>
    %c0_2 = arith.constant 0 : index
    %c0_3 = arith.constant 0 : index
    %3 = vector.load %arg2[%c0_2, %c0_3] : memref<2x290xf32, #tpu.memory_space<vmem>>, vector<1x290xf32>
    %4 = vector.broadcast %3 : vector<1x290xf32> to vector<4x290xf32>
    %5 = arith.mulf %2, %4 : vector<4x290xf32>
    %c1 = arith.constant 1 : index
    %c0_4 = arith.constant 0 : index
    %6 = vector.load %arg2[%c1, %c0_4] : memref<2x290xf32, #tpu.memory_space<vmem>>, vector<1x290xf32>
    %7 = vector.broadcast %6 : vector<1x290xf32> to vector<4x290xf32>
    %8 = arith.mulf %2, %7 : vector<4x290xf32>
    %9 = vector.extract_strided_slice %5 {offsets = [0, 0], sizes = [4, 256], strides = [1, 1]} : vector<4x290xf32> to vector<4x256xf32>
    %c0_5 = arith.constant 0 : index
    %c0_6 = arith.constant 0 : index
    %10 = vector.load %arg10[%c0_5, %c0_6] : memref<36x256xf32, #tpu.memory_space<vmem>>, vector<4x256xf32>
    tpu.vector_store %arg10[%c0_5, %c0_6], %9 {strides = array<i32>} : memref<36x256xf32, #tpu.memory_space<vmem>>, vector<4x256xf32>,
    %11 = vector.extract_strided_slice %2 {offsets = [0, 1], sizes = [4, 256], strides = [1, 1]} : vector<4x290xf32> to vector<4x256xf32>
    %c4 = arith.constant 4 : index
    %c0_7 = arith.constant 0 : index
    %12 = vector.load %arg10[%c4, %c0_7] : memref<36x256xf32, #tpu.memory_space<vmem>>, vector<4x256xf32>
    tpu.vector_store %arg10[%c4, %c0_7], %11 {strides = array<i32>} : memref<36x256xf32, #tpu.memory_space<vmem>>, vector<4x256xf32>,
    %13 = vector.extract_strided_slice %8 {offsets = [0, 2], sizes = [4, 256], strides = [1, 1]} : vector<4x290xf32> to vector<4x256xf32>
    %c8 = arith.constant 8 : index
    %c0_8 = arith.constant 0 : index
    %14 = vector.load %arg10[%c8, %c0_8] : memref<36x256xf32, #tpu.memory_space<vmem>>, vector<4x256xf32>
    tpu.vector_store %arg10[%c8, %c0_8], %13 {strides = array<i32>} : memref<36x256xf32, #tpu.memory_space<vmem>>, vector<4x256xf32>,
    %15 = vector.extract_strided_slice %5 {offsets = [0, 16], sizes = [4, 256], strides = [1, 1]} : vector<4x290xf32> to vector<4x256xf32>
    %c12 = arith.constant 12 : index
    %c0_9 = arith.constant 0 : index
    %16 = vector.load %arg10[%c12, %c0_9] : memref<36x256xf32, #tpu.memory_space<vmem>>, vector<4x256xf32>
    tpu.vector_store %arg10[%c12, %c0_9], %15 {strides = array<i32>} : memref<36x256xf32, #tpu.memory_space<vmem>>, vector<4x256xf32>,
    %17 = vector.extract_strided_slice %2 {offsets = [0, 17], sizes = [4, 256], strides = [1, 1]} : vector<4x290xf32> to vector<4x256xf32>
    %c16 = arith.constant 16 : index
    %c0_10 = arith.constant 0 : index
    %18 = vector.load %arg10[%c16, %c0_10] : memref<36x256xf32, #tpu.memory_space<vmem>>, vector<4x256xf32>
    tpu.vector_store %arg10[%c16, %c0_10], %17 {strides = array<i32>} : memref<36x256xf32, #tpu.memory_space<vmem>>, vector<4x256xf32>,
    %19 = vector.extract_strided_slice %8 {offsets = [0, 18], sizes = [4, 256], strides = [1, 1]} : vector<4x290xf32> to vector<4x256xf32>
    %c20 = arith.constant 20 : index
    %c0_11 = arith.constant 0 : index
    %20 = vector.load %arg10[%c20, %c0_11] : memref<36x256xf32, #tpu.memory_space<vmem>>, vector<4x256xf32>
    tpu.vector_store %arg10[%c20, %c0_11], %19 {strides = array<i32>} : memref<36x256xf32, #tpu.memory_space<vmem>>, vector<4x256xf32>,
    %21 = vector.extract_strided_slice %5 {offsets = [0, 32], sizes = [4, 256], strides = [1, 1]} : vector<4x290xf32> to vector<4x256xf32>
    %c24 = arith.constant 24 : index
    %c0_12 = arith.constant 0 : index
    %22 = vector.load %arg10[%c24, %c0_12] : memref<36x256xf32, #tpu.memory_space<vmem>>, vector<4x256xf32>
    tpu.vector_store %arg10[%c24, %c0_12], %21 {strides = array<i32>} : memref<36x256xf32, #tpu.memory_space<vmem>>, vector<4x256xf32>,
    %23 = vector.extract_strided_slice %2 {offsets = [0, 33], sizes = [4, 256], strides = [1, 1]} : vector<4x290xf32> to vector<4x256xf32>
    %c28 = arith.constant 28 : index
    %c0_13 = arith.constant 0 : index
    %24 = vector.load %arg10[%c28, %c0_13] : memref<36x256xf32, #tpu.memory_space<vmem>>, vector<4x256xf32>
    tpu.vector_store %arg10[%c28, %c0_13], %23 {strides = array<i32>} : memref<36x256xf32, #tpu.memory_space<vmem>>, vector<4x256xf32>,
    %25 = vector.extract_strided_slice %8 {offsets = [0, 34], sizes = [4, 256], strides = [1, 1]} : vector<4x290xf32> to vector<4x256xf32>
    %c32 = arith.constant 32 : index
    %c0_14 = arith.constant 0 : index
    %26 = vector.load %arg10[%c32, %c0_14] : memref<36x256xf32, #tpu.memory_space<vmem>>, vector<4x256xf32>
    tpu.vector_store %arg10[%c32, %c0_14], %25 {strides = array<i32>} : memref<36x256xf32, #tpu.memory_space<vmem>>, vector<4x256xf32>,
    %c0_15 = arith.constant 0 : index
    %c0_16 = arith.constant 0 : index
    %27 = vector.load %arg10[%c0_15, %c0_16] : memref<36x256xf32, #tpu.memory_space<vmem>>, vector<36x256xf32>
    %28 = arith.truncf %27 : vector<36x256xf32> to vector<36x256xbf16>
    %c0_17 = arith.constant 0 : index
    %c0_18 = arith.constant 0 : index
    %29 = vector.load %arg3[%c0_17, %c0_18] : memref<32x36xbf16, #tpu.memory_space<vmem>>, vector<32x36xbf16>
    %cst = arith.constant dense<0.000000e+00> : vector<32x256xf32>
    %30 = tpu.matmul %29, %28, %cst {dimension_numbers = #tpu.dot_dimension_numbers<[1], [0], [0], [1], [0, 0, 1, 1], [], []>} : vector<32x36xbf16>, vector<36x256xbf16>, vector<32x256xf32> -> vector<32x256xf32>
    %c0_19 = arith.constant 0 : index
    %c0_20 = arith.constant 0 : index
    %31 = vector.load %arg4[%c0_19, %c0_20] : memref<32x1xf32, #tpu.memory_space<vmem>>, vector<32x1xf32>
    %32 = vector.broadcast %31 : vector<32x1xf32> to vector<32x256xf32>
    %33 = arith.addf %30, %32 : vector<32x256xf32>
    %cst_21 = arith.constant 0.000000e+00 : f32
    %34 = vector.broadcast %cst_21 : f32 to vector<32x256xf32>
    %35 = arith.maximumf %33, %34 : vector<32x256xf32>
    %36 = arith.truncf %35 : vector<32x256xf32> to vector<32x256xbf16>
    %c0_22 = arith.constant 0 : index
    %c0_23 = arith.constant 0 : index
    %37 = vector.load %arg5[%c0_22, %c0_23] : memref<96x32xbf16, #tpu.memory_space<vmem>>, vector<96x32xbf16>
    %cst_24 = arith.constant dense<0.000000e+00> : vector<96x256xf32>
    %38 = tpu.matmul %37, %36, %cst_24 {dimension_numbers = #tpu.dot_dimension_numbers<[1], [0], [0], [1], [0, 0, 1, 1], [], []>} : vector<96x32xbf16>, vector<32x256xbf16>, vector<96x256xf32> -> vector<96x256xf32>
    %c0_25 = arith.constant 0 : index
    %c0_26 = arith.constant 0 : index
    %39 = vector.load %arg6[%c0_25, %c0_26] : memref<96x1xf32, #tpu.memory_space<vmem>>, vector<96x1xf32>
    %40 = vector.broadcast %39 : vector<96x1xf32> to vector<96x256xf32>
    %41 = arith.addf %38, %40 : vector<96x256xf32>
    %c0_27 = arith.constant 0 : index
    %c0_28 = arith.constant 0 : index
    %42 = vector.load %arg7[%c0_27, %c0_28] : memref<32x32xbf16, #tpu.memory_space<vmem>>, vector<32x32xbf16>
    %c0_29 = arith.constant 0 : index
    %c0_30 = arith.constant 0 : index
    %43 = vector.load %arg8[%c0_29, %c0_30] : memref<1x32xf32, #tpu.memory_space<vmem>>, vector<1x32xf32>
    %44 = vector.extract_strided_slice %41 {offsets = [32, 0], sizes = [32, 256], strides = [1, 1]} : vector<96x256xf32> to vector<32x256xf32>
    %45 = arith.truncf %44 : vector<32x256xf32> to vector<32x256xbf16>
    %46 = vector.extract_strided_slice %41 {offsets = [64, 0], sizes = [32, 256], strides = [1, 1]} : vector<96x256xf32> to vector<32x256xf32>
    %47 = arith.truncf %46 : vector<32x256xf32> to vector<32x256xbf16>
    %48 = vector.extract_strided_slice %41 {offsets = [0, 0], sizes = [32, 256], strides = [1, 1]} : vector<96x256xf32> to vector<32x256xf32>
    %49 = tpu.transpose %48, [1, 0] : vector<32x256xf32> -> vector<256x32xf32>
    %50 = arith.truncf %49 : vector<256x32xf32> to vector<256x32xbf16>
    %51 = vector.extract_strided_slice %50 {offsets = [0, 0], sizes = [64, 32], strides = [1, 1]} : vector<256x32xbf16> to vector<64x32xbf16>
    %cst_31 = arith.constant dense<0.000000e+00> : vector<64x256xf32>
    %52 = tpu.matmul %51, %45, %cst_31 {dimension_numbers = #tpu.dot_dimension_numbers<[1], [0], [0], [1], [0, 0, 1, 1], [], []>} : vector<64x32xbf16>, vector<32x256xbf16>, vector<64x256xf32> -> vector<64x256xf32>
    %cst_32 = arith.constant dense<0xFF800000> : vector<64xf32>
    %53 = vector.multi_reduction <maximumf>, %52, %cst_32 [1] : vector<64x256xf32> to vector<64xf32>
    %54 = vector.shape_cast %53 : vector<64xf32> to vector<64x1xf32>
    %55 = vector.broadcast %54 : vector<64x1xf32> to vector<64x256xf32>
    %56 = arith.subf %52, %55 : vector<64x256xf32>
    %57 = math.exp %56 : vector<64x256xf32>
    %cst_33 = arith.constant dense<0.000000e+00> : vector<64xf32>
    %58 = vector.multi_reduction <add>, %57, %cst_33 [1] : vector<64x256xf32> to vector<64xf32>
    %59 = vector.shape_cast %58 : vector<64xf32> to vector<64x1xf32>
    %60 = tpu.reciprocal %59 {approx = true} : vector<64x1xf32> -> vector<64x1xf32>
    %61 = vector.broadcast %60 : vector<64x1xf32> to vector<64x256xf32>
    %62 = arith.mulf %57, %61 : vector<64x256xf32>
    %63 = arith.truncf %62 : vector<64x256xf32> to vector<64x256xbf16>
    %cst_34 = arith.constant dense<0.000000e+00> : vector<64x32xf32>
    %64 = tpu.matmul %63, %47, %cst_34 {dimension_numbers = #tpu.dot_dimension_numbers<[1], [1], [0], [0], [0, 0, 1, 0], [], []>} : vector<64x256xbf16>, vector<32x256xbf16>, vector<64x32xf32> -> vector<64x32xf32>
    %65 = arith.truncf %64 : vector<64x32xf32> to vector<64x32xbf16>
    %cst_35 = arith.constant dense<0.000000e+00> : vector<64x32xf32>
    %66 = tpu.matmul %65, %42, %cst_35 {dimension_numbers = #tpu.dot_dimension_numbers<[1], [1], [0], [0], [0, 0, 1, 0], [], []>} : vector<64x32xbf16>, vector<32x32xbf16>, vector<64x32xf32> -> vector<64x32xf32>
    %67 = vector.broadcast %43 : vector<1x32xf32> to vector<64x32xf32>
    %68 = arith.addf %66, %67 : vector<64x32xf32>
    %c0_36 = arith.constant 0 : index
    %c0_37 = arith.constant 0 : index
    %c0_38 = arith.constant 0 : index
    %69 = vector.load %arg9[%c0_36, %c0_37, %c0_38] : memref<1x256x32xf32, #tpu.memory_space<vmem>>, vector<1x64x32xf32>
    %70 = vector.shape_cast %69 : vector<1x64x32xf32> to vector<64x32xf32>
    %71 = vector.shape_cast %68 : vector<64x32xf32> to vector<1x64x32xf32>
    tpu.vector_store %arg9[%c0_36, %c0_37, %c0_38], %71 {strides = array<i32>} : memref<1x256x32xf32, #tpu.memory_space<vmem>>, vector<1x64x32xf32>,
    %72 = vector.extract_strided_slice %50 {offsets = [64, 0], sizes = [64, 32], strides = [1, 1]} : vector<256x32xbf16> to vector<64x32xbf16>
    %cst_39 = arith.constant dense<0.000000e+00> : vector<64x256xf32>
    %73 = tpu.matmul %72, %45, %cst_39 {dimension_numbers = #tpu.dot_dimension_numbers<[1], [0], [0], [1], [0, 0, 1, 1], [], []>} : vector<64x32xbf16>, vector<32x256xbf16>, vector<64x256xf32> -> vector<64x256xf32>
    %cst_40 = arith.constant dense<0xFF800000> : vector<64xf32>
    %74 = vector.multi_reduction <maximumf>, %73, %cst_40 [1] : vector<64x256xf32> to vector<64xf32>
    %75 = vector.shape_cast %74 : vector<64xf32> to vector<64x1xf32>
    %76 = vector.broadcast %75 : vector<64x1xf32> to vector<64x256xf32>
    %77 = arith.subf %73, %76 : vector<64x256xf32>
    %78 = math.exp %77 : vector<64x256xf32>
    %cst_41 = arith.constant dense<0.000000e+00> : vector<64xf32>
    %79 = vector.multi_reduction <add>, %78, %cst_41 [1] : vector<64x256xf32> to vector<64xf32>
    %80 = vector.shape_cast %79 : vector<64xf32> to vector<64x1xf32>
    %81 = tpu.reciprocal %80 {approx = true} : vector<64x1xf32> -> vector<64x1xf32>
    %82 = vector.broadcast %81 : vector<64x1xf32> to vector<64x256xf32>
    %83 = arith.mulf %78, %82 : vector<64x256xf32>
    %84 = arith.truncf %83 : vector<64x256xf32> to vector<64x256xbf16>
    %cst_42 = arith.constant dense<0.000000e+00> : vector<64x32xf32>
    %85 = tpu.matmul %84, %47, %cst_42 {dimension_numbers = #tpu.dot_dimension_numbers<[1], [1], [0], [0], [0, 0, 1, 0], [], []>} : vector<64x256xbf16>, vector<32x256xbf16>, vector<64x32xf32> -> vector<64x32xf32>
    %86 = arith.truncf %85 : vector<64x32xf32> to vector<64x32xbf16>
    %cst_43 = arith.constant dense<0.000000e+00> : vector<64x32xf32>
    %87 = tpu.matmul %86, %42, %cst_43 {dimension_numbers = #tpu.dot_dimension_numbers<[1], [1], [0], [0], [0, 0, 1, 0], [], []>} : vector<64x32xbf16>, vector<32x32xbf16>, vector<64x32xf32> -> vector<64x32xf32>
    %88 = vector.broadcast %43 : vector<1x32xf32> to vector<64x32xf32>
    %89 = arith.addf %87, %88 : vector<64x32xf32>
    %c0_44 = arith.constant 0 : index
    %c64 = arith.constant 64 : index
    %c0_45 = arith.constant 0 : index
    %90 = vector.load %arg9[%c0_44, %c64, %c0_45] : memref<1x256x32xf32, #tpu.memory_space<vmem>>, vector<1x64x32xf32>
    %91 = vector.shape_cast %90 : vector<1x64x32xf32> to vector<64x32xf32>
    %92 = vector.shape_cast %89 : vector<64x32xf32> to vector<1x64x32xf32>
    tpu.vector_store %arg9[%c0_44, %c64, %c0_45], %92 {strides = array<i32>} : memref<1x256x32xf32, #tpu.memory_space<vmem>>, vector<1x64x32xf32>,
    %93 = vector.extract_strided_slice %50 {offsets = [128, 0], sizes = [64, 32], strides = [1, 1]} : vector<256x32xbf16> to vector<64x32xbf16>
    %cst_46 = arith.constant dense<0.000000e+00> : vector<64x256xf32>
    %94 = tpu.matmul %93, %45, %cst_46 {dimension_numbers = #tpu.dot_dimension_numbers<[1], [0], [0], [1], [0, 0, 1, 1], [], []>} : vector<64x32xbf16>, vector<32x256xbf16>, vector<64x256xf32> -> vector<64x256xf32>
    %cst_47 = arith.constant dense<0xFF800000> : vector<64xf32>
    %95 = vector.multi_reduction <maximumf>, %94, %cst_47 [1] : vector<64x256xf32> to vector<64xf32>
    %96 = vector.shape_cast %95 : vector<64xf32> to vector<64x1xf32>
    %97 = vector.broadcast %96 : vector<64x1xf32> to vector<64x256xf32>
    %98 = arith.subf %94, %97 : vector<64x256xf32>
    %99 = math.exp %98 : vector<64x256xf32>
    %cst_48 = arith.constant dense<0.000000e+00> : vector<64xf32>
    %100 = vector.multi_reduction <add>, %99, %cst_48 [1] : vector<64x256xf32> to vector<64xf32>
    %101 = vector.shape_cast %100 : vector<64xf32> to vector<64x1xf32>
    %102 = tpu.reciprocal %101 {approx = true} : vector<64x1xf32> -> vector<64x1xf32>
    %103 = vector.broadcast %102 : vector<64x1xf32> to vector<64x256xf32>
    %104 = arith.mulf %99, %103 : vector<64x256xf32>
    %105 = arith.truncf %104 : vector<64x256xf32> to vector<64x256xbf16>
    %cst_49 = arith.constant dense<0.000000e+00> : vector<64x32xf32>
    %106 = tpu.matmul %105, %47, %cst_49 {dimension_numbers = #tpu.dot_dimension_numbers<[1], [1], [0], [0], [0, 0, 1, 0], [], []>} : vector<64x256xbf16>, vector<32x256xbf16>, vector<64x32xf32> -> vector<64x32xf32>
    %107 = arith.truncf %106 : vector<64x32xf32> to vector<64x32xbf16>
    %cst_50 = arith.constant dense<0.000000e+00> : vector<64x32xf32>
    %108 = tpu.matmul %107, %42, %cst_50 {dimension_numbers = #tpu.dot_dimension_numbers<[1], [1], [0], [0], [0, 0, 1, 0], [], []>} : vector<64x32xbf16>, vector<32x32xbf16>, vector<64x32xf32> -> vector<64x32xf32>
    %109 = vector.broadcast %43 : vector<1x32xf32> to vector<64x32xf32>
    %110 = arith.addf %108, %109 : vector<64x32xf32>
    %c0_51 = arith.constant 0 : index
    %c128 = arith.constant 128 : index
    %c0_52 = arith.constant 0 : index
    %111 = vector.load %arg9[%c0_51, %c128, %c0_52] : memref<1x256x32xf32, #tpu.memory_space<vmem>>, vector<1x64x32xf32>
    %112 = vector.shape_cast %111 : vector<1x64x32xf32> to vector<64x32xf32>
    %113 = vector.shape_cast %110 : vector<64x32xf32> to vector<1x64x32xf32>
    tpu.vector_store %arg9[%c0_51, %c128, %c0_52], %113 {strides = array<i32>} : memref<1x256x32xf32, #tpu.memory_space<vmem>>, vector<1x64x32xf32>,
    %114 = vector.extract_strided_slice %50 {offsets = [192, 0], sizes = [64, 32], strides = [1, 1]} : vector<256x32xbf16> to vector<64x32xbf16>
    %cst_53 = arith.constant dense<0.000000e+00> : vector<64x256xf32>
    %115 = tpu.matmul %114, %45, %cst_53 {dimension_numbers = #tpu.dot_dimension_numbers<[1], [0], [0], [1], [0, 0, 1, 1], [], []>} : vector<64x32xbf16>, vector<32x256xbf16>, vector<64x256xf32> -> vector<64x256xf32>
    %cst_54 = arith.constant dense<0xFF800000> : vector<64xf32>
    %116 = vector.multi_reduction <maximumf>, %115, %cst_54 [1] : vector<64x256xf32> to vector<64xf32>
    %117 = vector.shape_cast %116 : vector<64xf32> to vector<64x1xf32>
    %118 = vector.broadcast %117 : vector<64x1xf32> to vector<64x256xf32>
    %119 = arith.subf %115, %118 : vector<64x256xf32>
    %120 = math.exp %119 : vector<64x256xf32>
    %cst_55 = arith.constant dense<0.000000e+00> : vector<64xf32>
    %121 = vector.multi_reduction <add>, %120, %cst_55 [1] : vector<64x256xf32> to vector<64xf32>
    %122 = vector.shape_cast %121 : vector<64xf32> to vector<64x1xf32>
    %123 = tpu.reciprocal %122 {approx = true} : vector<64x1xf32> -> vector<64x1xf32>
    %124 = vector.broadcast %123 : vector<64x1xf32> to vector<64x256xf32>
    %125 = arith.mulf %120, %124 : vector<64x256xf32>
    %126 = arith.truncf %125 : vector<64x256xf32> to vector<64x256xbf16>
    %cst_56 = arith.constant dense<0.000000e+00> : vector<64x32xf32>
    %127 = tpu.matmul %126, %47, %cst_56 {dimension_numbers = #tpu.dot_dimension_numbers<[1], [1], [0], [0], [0, 0, 1, 0], [], []>} : vector<64x256xbf16>, vector<32x256xbf16>, vector<64x32xf32> -> vector<64x32xf32>
    %128 = arith.truncf %127 : vector<64x32xf32> to vector<64x32xbf16>
    %cst_57 = arith.constant dense<0.000000e+00> : vector<64x32xf32>
    %129 = tpu.matmul %128, %42, %cst_57 {dimension_numbers = #tpu.dot_dimension_numbers<[1], [1], [0], [0], [0, 0, 1, 0], [], []>} : vector<64x32xbf16>, vector<32x32xbf16>, vector<64x32xf32> -> vector<64x32xf32>
    %130 = vector.broadcast %43 : vector<1x32xf32> to vector<64x32xf32>
    %131 = arith.addf %129, %130 : vector<64x32xf32>
    %c0_58 = arith.constant 0 : index
    %c192 = arith.constant 192 : index
    %c0_59 = arith.constant 0 : index
    %132 = vector.load %arg9[%c0_58, %c192, %c0_59] : memref<1x256x32xf32, #tpu.memory_space<vmem>>, vector<1x64x32xf32>
    %133 = vector.shape_cast %132 : vector<1x64x32xf32> to vector<64x32xf32>
    %134 = vector.shape_cast %131 : vector<64x32xf32> to vector<1x64x32xf32>
    tpu.vector_store %arg9[%c0_58, %c192, %c0_59], %134 {strides = array<i32>} : memref<1x256x32xf32, #tpu.memory_space<vmem>>, vector<1x64x32xf32>,
    return
  }
  func.func @transform_0(%arg0: i32) -> (i32, i32, i32) {
    %c0_i32 = arith.constant 0 : i32
    %c0_i32_0 = arith.constant 0 : i32
    %c0_i32_1 = arith.constant 0 : i32
    return %arg0, %c0_i32, %c0_i32_0 : i32, i32, i32
  }
  func.func @transform_1(%arg0: i32) -> (i32, i32) {
    %c0_i32 = arith.constant 0 : i32
    %c0_i32_0 = arith.constant 0 : i32
    %c0_i32_1 = arith.constant 0 : i32
    return %c0_i32, %c0_i32_0 : i32, i32
  }
  func.func @transform_2(%arg0: i32) -> (i32, i32) {
    %c0_i32 = arith.constant 0 : i32
    %c0_i32_0 = arith.constant 0 : i32
    %c0_i32_1 = arith.constant 0 : i32
    return %c0_i32, %c0_i32_0 : i32, i32
  }
  func.func @transform_3(%arg0: i32) -> (i32, i32) {
    %c0_i32 = arith.constant 0 : i32
    %c0_i32_0 = arith.constant 0 : i32
    %c0_i32_1 = arith.constant 0 : i32
    return %c0_i32, %c0_i32_0 : i32, i32
  }
  func.func @transform_4(%arg0: i32) -> (i32, i32) {
    %c0_i32 = arith.constant 0 : i32
    %c0_i32_0 = arith.constant 0 : i32
    %c0_i32_1 = arith.constant 0 : i32
    return %c0_i32, %c0_i32_0 : i32, i32
  }
  func.func @transform_5(%arg0: i32) -> (i32, i32) {
    %c0_i32 = arith.constant 0 : i32
    %c0_i32_0 = arith.constant 0 : i32
    %c0_i32_1 = arith.constant 0 : i32
    return %c0_i32, %c0_i32_0 : i32, i32
  }
  func.func @transform_6(%arg0: i32) -> (i32, i32) {
    %c0_i32 = arith.constant 0 : i32
    %c0_i32_0 = arith.constant 0 : i32
    %c0_i32_1 = arith.constant 0 : i32
    return %c0_i32, %c0_i32_0 : i32, i32
  }
  func.func @transform_7(%arg0: i32) -> (i32, i32) {
    %c0_i32 = arith.constant 0 : i32
    %c0_i32_0 = arith.constant 0 : i32
    %c0_i32_1 = arith.constant 0 : i32
    return %c0_i32, %c0_i32_0 : i32, i32
  }
  func.func @transform_8(%arg0: i32) -> (i32, i32, i32) {
    %c0_i32 = arith.constant 0 : i32
    %c0_i32_0 = arith.constant 0 : i32
    %c0_i32_1 = arith.constant 0 : i32
    return %arg0, %c0_i32, %c0_i32_0 : i32, i32, i32
  }
}

</mosaic_0001>

<bundles_post_ra>
// kernel: full_net_forward.1
= control target key start
LH: loop header
LB: loop body
LE: loop exit
PB: predicated region body
PF: predicated region fallthrough
CT: control target
= control target key end

     0   :  { %s2915_s27 = smov 0   ;;  %s3733_s0 = inlined_call_operand.vmem [shape: bf16[2,4,290], index: 0, kind: input, shape index: {}]   ;;  %s3734_s1 = inlined_call_operand.vmem [shape: f32[2,290], index: 1, kind: input, shape index: {}]   ;;  %s3735_s2 = inlined_call_operand.vmem [shape: bf16[32,36], index: 2, kind: input, shape index: {}]   ;;  %s3736_s3 = inlined_call_operand.vmem [shape: f32[32,1], index: 3, kind: input, shape index: {}]   ;;  %s3737_s4 = inlined_call_operand.vmem [shape: bf16[96,32], index: 4, kind: input, shape index: {}]   ;;  %s3738_s5 = inlined_call_operand.vmem [shape: f32[96,1], index: 5, kind: input, shape index: {}]   ;;  %s3739_s6 = inlined_call_operand.vmem [shape: bf16[32,32], index: 6, kind: input, shape index: {}]   ;;  %s3740_s7 = inlined_call_operand.vmem [shape: f32[1,32], index: 7, kind: input, shape index: {}]   ;;  %s3741_s8 = inlined_call_operand.vmem [shape: f32[2,256,32], index: 8, kind: output, shape index: {}]  }
   0x1 LB: > { %s2468_s28 = sadd.s32 4294967295, %s2859_s27   ;;  %p2472_p0 = scmp.ge.s32.totalorder %s2859_s27, 1  ;;  %s2859_s27 = sphi %s2915_s27, %s18_s27  }
   0x2   : > { %p262_p1 = scmp.lt.s32.totalorder %s2859_s27, 3 }
   0x4   : > { %p263_p2 = pnand %p2472_p0, %p262_p1 }
   0x5   : > { %p296_p3 = scmp.lt.s32.totalorder (!%p263_p2), %s2468_s28, 1  ;;  %v312_v0 = vlaneseq (!%p263_p2)  ;;  %v310_v1 = vld [vmem:[%s3734_s1] ss:$2 sm:$0x7] (!%p263_p2)  ;;  %s2861_s15 = smov (!%p263_p2), 126   ;;  %v2869_v33 = vmov (!%p263_p2), 0  }
   0x6   : > { %266 = sbr.rel (%p263_p2) target bundleno = 3750 (0xea6), region = 52  ;;  %v2476_v3 = vld [vmem:[%s3734_s1 + $0x1] ss:$2 sm:$0x7] (!%p263_p2)  ;;  %s2862_s16 = smov (!%p263_p2), 127   ;;  %571 = vmatprep.mubr.bf16.mxu0 (!%p263_p2), %v2869_v33  ;;  %2646 = vset.pattern.permute.xlu1 (!%p263_p2), %v2869_v33  ;;  %v492_v35 = vld [vmem:[%s3736_s3 + $0x8] sm:$0xff] (!%p263_p2) }
   0x7   : > { %v313_v2 = vshrl.u32 (!%p263_p2), %v312_v0, 7  ;;  %s2863_s17 = smov (!%p263_p2), 112   ;;  %s2864_s18 = smov (!%p263_p2), 110   ;;  %2647 = vset.pattern.permute.xlu0 (!%p263_p2), %v2869_v33  ;;  %769 = vmatprep.mubr.bf16.mxu1 (!%p263_p2), %v2869_v33  ;;  %v491_v34 = vld [vmem:[%s3736_s3] sm:$0xff] (!%p263_p2)  ;;  %v493_v36 = vld [vmem:[%s3736_s3 + $0x10] sm:$0xff] (!%p263_p2)  ;;  %v494_v38 = vld [vmem:[%s3736_s3 + $0x18] sm:$0xff] (!%p263_p2) }
   0x8   : > { %s2865_s19 = smov (!%p263_p2), 111   ;;  %s2866_s20 = smov (!%p263_p2), 96   ;;  %v616_v37 = vld [vmem:[%s3738_s5] sm:$0xff] (!%p263_p2)  ;;  %v618_v39 = vld [vmem:[%s3738_s5 + $0x10] sm:$0xff] (!%p263_p2)  ;;  %v617_v40 = vld [vmem:[%s3738_s5 + $0x8] sm:$0xff] (!%p263_p2)  ;;  %vm364_vm0 = vcmask (!%p263_p2), 1039360  }
   0x9   : > { %v314_v4 = vsub.s32 (!%p263_p2), 0, %v313_v2  ;;  %v318_v5 = vsub.s32 (!%p263_p2), 1, %v313_v2  ;;  %v322_v6 = vsub.s32 (!%p263_p2), 2, %v313_v2  ;;  %s2867_s21 = smov (!%p263_p2), 95   ;;  %s2868_s22 = smov (!%p263_p2), 94   ;;  %v620_v41 = vld [vmem:[%s3738_s5 + $0x20] sm:$0xff] (!%p263_p2) }
   0xa   : > { %v619_v42 = vld [vmem:[%s3738_s5 + $0x18] sm:$0xff] (!%p263_p2)  ;;  %v622_v43 = vld [vmem:[%s3738_s5 + $0x30] sm:$0xff] (!%p263_p2)  ;;  %v621_v44 = vld [vmem:[%s3738_s5 + $0x28] sm:$0xff] (!%p263_p2)  ;;  %vm380_vm1 = vcmask (!%p263_p2), 1031168   ;;  %vm396_vm2 = vcmask (!%p263_p2), 916480   ;;  %vm410_vm3 = vcmask (!%p263_p2), 908288  }
   0xb   : > { %v315_v7 = vrot.slane (!%p263_p2), %v310_v1, %v314_v4  ;;  %v319_v8 = vrot.slane (!%p263_p2), %v310_v1, %v318_v5  ;;  %v335_v9 = vrot.slane (!%p263_p2), %v2476_v3, %v314_v4  ;;  %v339_v10 = vrot.slane (!%p263_p2), %v2476_v3, %v318_v5  ;;  %v623_v45 = vld [vmem:[%s3738_s5 + $0x38] sm:$0xff] (!%p263_p2) }
   0xc   : > { %v343_v12 = vrot.slane (!%p263_p2), %v2476_v3, %v322_v6  ;;  %v323_v23 = vrot.slane (!%p263_p2), %v310_v1, %v322_v6  ;;  %vm425_vm4 = vcmask (!%p263_p2), 900096   ;;  %vm438_vm5 = vcmask (!%p263_p2), 785408  }
   0xd   : > { %s3746_s28 = smov (!%p296_p3, %s2468_s28), 1  ;;  %v325_v15 = vcombine.low %v315_v7, %v319_v8  ;;  %v345_v16 = vcombine.low %v335_v9, %v339_v10  ;;  %vm451_vm6 = vcmask 777216   ;;  %vm464_vm7 = vcmask 769024  }
   0xe   : > { %s2612_s11 = smul.u32 6, %s3746_s28  ;;  %vm532_vm8 = vcmask 1041408   ;;  %vm525_vm9 = vcmask 293888   ;;  %vm718_vm10 = vcmask 261120  }
  0x10   : > { %s300_s14 = scalar_lea.vmem %s3733_s0, %s2612_s11 }
  0x11   : > { %v307_v11 = vld [vmem:[%s300_s14] sm:$0x3f] }
  0x12   : > { %v309_v13 = vunpack.c.h.bf16 %v307_v11  ;;  %v308_v14 = vunpack.c.l.bf16 %v307_v11 }
  0x14   : > { %v348_v17 = vmul.f32 %v343_v12, %v309_v13  ;;  %v357_v18 = vcombine.low %v309_v13, %v309_v13  ;;  %v327_v19 = vmul.f32 %v325_v15, %v308_v14  ;;  %v347_v22 = vmul.f32 %v345_v16, %v308_v14 }
  0x15   : > { %v356_v24 = vcombine.low %v308_v14, %v308_v14  ;;  %v328_v26 = vmul.f32 %v323_v23, %v309_v13  ;;  %v403_v29 = vcombine.high %v308_v14, %v308_v14 }
  0x16   : > { %378 = vrot.lane.b32.xlu1 %v348_v17, %s2861_s15  ;;  %v2631_v20 = vpack.i.bf16 %v357_v18, %v308_v14  ;;  %352 = vst [vmem:[#allocation2] sm:$0xf] %v327_v19  ;;  %v350_v21 = vcombine.high %v327_v19, %v327_v19  ;;  %v373_v25 = vcombine.high %v347_v22, %v347_v22 }
  0x17   : > { %v388_v27 = vcombine.low %v327_v19, %v327_v19  ;;  %v389_v28 = vcombine.low %v328_v26, %v328_v26  ;;  %v2636_v30 = vpack.i.bf16 %v309_v13, %v403_v29  ;;  %v418_v31 = vcombine.low %v348_v17, %v348_v17 }
  0x18   : > { %2632 = vrot.lane.b32.xlu0 %v2631_v20, %s2862_s16  ;;  %353 = vst [vmem:[#allocation2 + $0x8] sm:$0xf] %v350_v21  ;;  %v417_v32 = vcombine.low %v347_v22, %v347_v22 }
  0x1a   : > { %392 = vrot.lane.b32.xlu1 %v327_v19, %s2863_s17 }
  0x1c   : > { %374 = vrot.lane.b32.xlu0 %v347_v22, %s2861_s15 }
  0x1e   : > { %358 = vrot.lane.b32.xlu1 %v356_v24, %s2862_s16 }
  0x20   : > { %376 = vrot.lane.b32.xlu0 %v373_v25, %s2861_s15  ;;  %s2531_s15 = sshll.u32 %s3746_s28, 8 }
  0x22   : > { %390 = vrot.lane.b32.xlu1 %v388_v27, %s2863_s17 }
  0x24   : > { %394 = vrot.lane.b32.xlu0 %v389_v28, %s2863_s17 }
  0x26   : > { %421 = vrot.lane.b32.xlu1 %v347_v22, %s2864_s18 }
  0x28   : > { %2637 = vrot.lane.b32.xlu0 %v2636_v30, %s2865_s19 }
  0x2a   : > { %434 = vrot.lane.b32.xlu1 %v350_v21, %s2866_s20 }
  0x2c   : > { %423 = vrot.lane.b32.xlu0 %v418_v31, %s2864_s18 }
  0x2e   : > { %2642 = vrot.lane.b32.xlu1 %v2631_v20, %s2867_s21 }
  0x30   : > { %436 = vrot.lane.b32.xlu0 %v328_v26, %s2866_s20 }
  0x32   : > { %419 = vrot.lane.b32.xlu1 %v417_v32, %s2864_s18 }
  0x34   : > { %404 = vrot.lane.b32.xlu0 %v308_v14, %s2865_s19 }
  0x36   : > { %445 = vrot.lane.b32.xlu1 %v356_v24, %s2867_s21 }
  0x38   : > { %432 = vrot.lane.b32.xlu0 %v327_v19, %s2866_s20  ;;  %s3297_s20 = scalar_lea.vmem %s3741_s8, %s2531_s15 }
  0x3a   : > { %460 = vrot.lane.b32.xlu1 %v373_v25, %s2868_s22 }
  0x3c   : > { %458 = vrot.lane.b32.xlu0 %v347_v22, %s2868_s22 }
  0x3e   : > { %497 = vperm.xlu1 %2646, %v491_v34  }
  0x40   : > { %462 = vrot.lane.b32.xlu0 %v348_v17, %s2868_s22 }
  0x42   : > { %507 = vperm.xlu1 %2646, %v493_v36  }
  0x44   : > { %502 = vperm.xlu0 %2647, %v492_v35  }
  0x46   : > { %512 = vperm.xlu1 %2646, %v494_v38  }
  0x48   : > { %630 = vperm.xlu0 %2647, %v616_v37  }
  0x4a   : > { %635 = vperm.xlu1 %2646, %v617_v40  }
  0x4c   : > { %640 = vperm.xlu0 %2647, %v618_v39  }
  0x4e   : > { %645 = vperm.xlu1 %2646, %v619_v42  }
  0x50   : > { %650 = vperm.xlu0 %2647, %v620_v41  }
  0x52   : > { %655 = vperm.xlu1 %2646, %v621_v44   ;;  %v2649_v44 = vld [vmem:[%s3735_s2 + $0x8] sm:$0xff]  }
  0x54   : > { %660 = vperm.xlu0 %2647, %v622_v43   ;;  %v2648_v43 = vld [vmem:[%s3735_s2] sm:$0xff]  }
  0x56   : > { %665 = vperm.xlu1 %2646, %v623_v45  }
  0x88   : > { %v379_v46 = vpop.permute.xlu1 %378 }
  0x8a   : > { %v2633_v47 = vpop.permute.xlu0 %2632 }
  0x8b   : > { %v2635_v48 = vunpack.i.h.bf16 %v2633_v47  ;;  %v2634_v49 = vunpack.i.l.bf16 %v2633_v47 }
  0x8c   : > { %v393_v50 = vpop.permute.xlu1 %392 }
  0x8d   : > { %v366_v51 = vsel %vm364_vm0, %v2634_v49, %v2635_v48 }
  0x8e   : > { %v375_v52 = vpop.permute.xlu0 %374  ;;  %370 = vst [vmem:[#allocation2 + $0x8] sm:$0xf0] %v366_v51 }
  0x90   : > { %v359_v53 = vpop.permute.xlu1 %358 }
  0x91   : > { %v365_v54 = vsel %vm364_vm0, %v359_v53, %v2634_v49 }
  0x92   : > { %369 = vst [vmem:[#allocation2] sm:$0xf0] %v365_v54  ;;  %v377_v55 = vpop.permute.xlu0 %376 }
  0x93   : > { %v381_v56 = vsel %vm380_vm1, %v375_v52, %v377_v55  ;;  %v382_v57 = vsel %vm380_vm1, %v377_v55, %v379_v46 }
  0x94   : > { %385 = vst [vmem:[#allocation2 + $0x10] sm:$0xf] %v381_v56  ;;  %386 = vst [vmem:[#allocation2 + $0x18] sm:$0xf] %v382_v57  ;;  %v391_v58 = vpop.permute.xlu1 %390 }
  0x95   : > { %v397_v59 = vsel %vm396_vm2, %v391_v58, %v393_v50  ;;  %v472_v7 = vld [vmem:[#allocation2 + $0x8] sm:$0xff] }
  0x96   : > { %401 = vst [vmem:[#allocation2 + $0x10] sm:$0xf0] %v397_v59  ;;  %v395_v60 = vpop.permute.xlu0 %394 }
  0x97   : > { %v398_v61 = vsel %vm396_vm2, %v393_v50, %v395_v60 }
  0x98   : > { %402 = vst [vmem:[#allocation2 + $0x18] sm:$0xf0] %v398_v61  ;;  %v422_v62 = vpop.permute.xlu1 %421 }
  0x99   : > { %v471_v11 = vld [vmem:[#allocation2] sm:$0xff] }
  0x9a   : > { %v2638_v63 = vpop.permute.xlu0 %2637 }
  0x9b   : > { %v2640_v0 = vunpack.i.h.bf16 %v2638_v63  ;;  %v2639_v1 = vunpack.i.l.bf16 %v2638_v63 }
  0x9c   : > { %v435_v2 = vpop.permute.xlu1 %434 }
  0x9d   : > { %v412_v3 = vsel %vm410_vm3, %v2639_v1, %v2640_v0  ;;  %v473_v5 = vld [vmem:[#allocation2 + $0x10] sm:$0xff] }
  0x9e   : > { %v424_v4 = vpop.permute.xlu0 %423  ;;  %416 = vst [vmem:[#allocation2 + $0x28] sm:$0xf] %v412_v3  ;;  %v481_v14 = vpack.c.bf16 %v473_v5, %v471_v11 }
  0x9f   : > { %v427_v6 = vsel %vm425_vm4, %v422_v62, %v424_v4  ;;  %v474_v8 = vld [vmem:[#allocation2 + $0x18] sm:$0xff] }
  0xa0   : > { %431 = vst [vmem:[#allocation2 + $0x28] sm:$0xf0] %v427_v6  ;;  %v2643_v9 = vpop.permute.xlu1 %2642  ;;  %v482_v10 = vpack.c.bf16 %v474_v8, %v472_v7 }
  0xa1   : > { %v2645_v12 = vunpack.i.h.bf16 %v2643_v9  ;;  %v2644_v13 = vunpack.i.l.bf16 %v2643_v9 }
  0xa2   : > { %v437_v15 = vpop.permute.xlu0 %436  ;;  %539 = vmatprep.subr.bf16.mxu0 %v482_v10 }
  0xa3   : > { %v440_v16 = vsel %vm438_vm5, %v435_v2, %v437_v15  ;;  %540 = vmatpush1.bf16.msra.mxu0 %v481_v14  ;;  %v453_v17 = vsel %vm451_vm6, %v2644_v13, %v2645_v12  ;;  %v2651_v14 = vld [vmem:[%s3737_s4 + $0x8] sm:$0xff]   ;;  %v2652_v15 = vld [vmem:[%s3737_s4 + $0x10] sm:$0xff]  }
  0xa4   : > { %444 = vst [vmem:[#allocation2 + $0x38] sm:$0xf] %v440_v16  ;;  %v420_v18 = vpop.permute.xlu1 %419  ;;  %457 = vst [vmem:[#allocation2 + $0x38] sm:$0xf0] %v453_v17  ;;  %v2653_v16 = vld [vmem:[%s3737_s4 + $0x18] sm:$0xff]  }
  0xa5   : > { %v426_v19 = vsel %vm425_vm4, %v420_v18, %v422_v62 }
  0xa6   : > { %430 = vst [vmem:[#allocation2 + $0x20] sm:$0xf0] %v426_v19  ;;  %v405_v20 = vpop.permute.xlu0 %404 }
  0xa7   : > { %v411_v21 = vsel %vm410_vm3, %v405_v20, %v2639_v1  ;;  %v476_v26 = vld [vmem:[#allocation2 + $0x28] sm:$0xff] }
  0xa8   : > { %415 = vst [vmem:[#allocation2 + $0x20] sm:$0xf] %v411_v21  ;;  %v446_v22 = vpop.permute.xlu1 %445 }
  0xa9   : > { %v452_v23 = vsel %vm451_vm6, %v446_v22, %v2644_v13  ;;  %v2650_v13 = vld [vmem:[%s3737_s4] sm:$0xff]  }
  0xaa   : > { %456 = vst [vmem:[#allocation2 + $0x30] sm:$0xf0] %v452_v23  ;;  %v433_v24 = vpop.permute.xlu0 %432 }
  0xab   : > { %v439_v25 = vsel %vm438_vm5, %v433_v24, %v435_v2  ;;  %v478_v27 = vld [vmem:[#allocation2 + $0x38] sm:$0xff] }
  0xac   : > { %443 = vst [vmem:[#allocation2 + $0x30] sm:$0xf] %v439_v25  ;;  %v461_v28 = vpop.permute.xlu1 %460  ;;  %v484_v29 = vpack.c.bf16 %v478_v27, %v476_v26 }
  0xae   : > { %v459_v30 = vpop.permute.xlu0 %458  ;;  %541 = vmatprep.subr.bf16.mxu0 %v484_v29 }
  0xaf   : > { %v465_v31 = vsel %vm464_vm7, %v459_v30, %v461_v28  ;;  %v475_v35 = vld [vmem:[#allocation2 + $0x20] sm:$0xff] }
  0xb0   : > { %469 = vst [vmem:[#allocation2 + $0x40] sm:$0xf] %v465_v31 }
  0xb2   : > { %v463_v32 = vpop.permute.xlu0 %462 }
  0xb3   : > { %v466_v34 = vsel %vm464_vm7, %v461_v28, %v463_v32  ;;  %v477_v36 = vld [vmem:[#allocation2 + $0x30] sm:$0xff] }
  0xb4   : > { %470 = vst [vmem:[#allocation2 + $0x48] sm:$0xf] %v466_v34  ;;  %v483_v37 = vpack.c.bf16 %v477_v36, %v475_v35 }
  0xb6   : > { %542 = vmatpush1.bf16.msra.mxu0 %v483_v37 }
  0xb7   : > { %v479_v38 = vld [vmem:[#allocation2 + $0x40] sm:$0xf] }
  0xb8   : > { %v485_v39 = vpack.c.bf16 %v479_v38, %v479_v38 }
  0xba   : > { %v534_v42 = vsel %vm532_vm8, %v485_v39, 0 }
  0xbb   : > { %v480_v40 = vld [vmem:[#allocation2 + $0x48] sm:$0xf] }
  0xbc   : > { %v486_v41 = vpack.c.bf16 %v480_v40, %v480_v40 }
  0xbd   : > { %v498_v45 = vpop.permute.xlu1 %497 }
  0xbe   : > { %2479 = vmatprep.subr.msk.bf16.mxu0 %vm532_vm8, %v486_v41 }
  0xbf   : > { %544 = vmatpush1.bf16.msra.mxu0 %v534_v42 }
  0xc1   : > { %v508_v54 = vpop.permute.xlu1 %507 }
  0xc2   : > { %2480 = vmatmul.mubr.msk.bf16.vlgmr.msra.gmra.mrb[0].mxu0 %vm525_vm9, %v2648_v43 }
  0xc3   : > { %581 = vmatprep.mubr.bf16.mxu0 %v2869_v33  ;;  %v503_v49 = vpop.permute.xlu0 %502 }
  0xc5   : > { %v513_v1 = vpop.permute.xlu1 %512 }
  0xc7   : > { %v3011_v17 = vpop.permute.xlu0 %630 }
  0xc9   : > { %v3018_v23 = vpop.permute.xlu1 %635 }
  0xca   : > { %2481 = vmatmul.mubr.msk.bf16.gmra.mrb[4].mxu0 %vm525_vm9, %v2649_v44 }
  0xcb   : > { %967 = vmatprep.mubr.bf16.mxu0 %v2869_v33  ;;  %v3021_v25 = vpop.permute.xlu0 %640 }
  0xcd   : > { %v3026_v30 = vpop.permute.xlu1 %645 }
  0xcf   : > { %v651_v37 = vpop.permute.xlu0 %650 }
  0xd1   : > { %v656_v35 = vpop.permute.xlu1 %655 }
 0x195   : > { %v573_v46 = vpop.f32.mrb[0].mxu0 }
 0x196   : > { %v574_v47 = vadd.f32 %v573_v46, %v498_v45  ;;  %v575_v48 = vpop.f32.mrb[1].mxu0 }
 0x197   : > { %v576_v50 = vadd.f32 %v575_v48, %v498_v45  ;;  %v577_v51 = vpop.f32.mrb[2].mxu0 }
 0x198   : > { %v578_v52 = vadd.f32 %v577_v51, %v503_v49  ;;  %v579_v53 = vpop.f32.mrb[3].mxu0  ;;  %v592_v56 = vmax.f32 %v574_v47, 0.0  ;;  %v666_v47 = vpop.permute.xlu1 %665 }
 0x199   : > { %v580_v55 = vadd.f32 %v579_v53, %v503_v49  ;;  %v593_v58 = vmax.f32 %v576_v50, 0.0  ;;  %v661_v49 = vpop.permute.xlu0 %660 }
 0x19a   : > { %v594_v57 = vmax.f32 %v578_v52, 0.0 }
 0x19b   : > { %v595_v59 = vmax.f32 %v580_v55, 0.0 }
 0x19c   : > { %v600_v60 = vpack.c.bf16 %v594_v57, %v592_v56 }
 0x19d   : > { %v583_v61 = vpop.f32.mrb[4].mxu0  ;;  %v601_v62 = vpack.c.bf16 %v595_v59, %v593_v58  ;;  %v3044_v58 = vld [vmem:[%s3739_s6] sm:$0xff]  }
 0x19e   : > { %v584_v63 = vadd.f32 %v583_v61, %v508_v54  ;;  %v585_v0 = vpop.f32.mrb[5].mxu0  ;;  %v2656_v59 = vld [vmem:[%s3737_s4 + $0x20] sm:$0xff]  }
 0x19f   : > { %v586_v2 = vadd.f32 %v585_v0, %v508_v54  ;;  %v587_v3 = vpop.f32.mrb[6].mxu0  ;;  %737 = vmatprep.subr.bf16.mxu1 %v601_v62  ;;  %v3061_v0 = vsel %vm718_vm10, %v3044_v58, 0 }
 0x1a0   : > { %v588_v4 = vadd.f32 %v587_v3, %v513_v1  ;;  %v589_v5 = vpop.f32.mrb[7].mxu0  ;;  %738 = vmatpush1.bf16.msra.mxu1 %v600_v60  ;;  %v596_v7 = vmax.f32 %v584_v63, 0.0  ;;  %v2657_v60 = vld [vmem:[%s3737_s4 + $0x28] sm:$0xff]  }
 0x1a1   : > { %v590_v6 = vadd.f32 %v589_v5, %v513_v1  ;;  %v597_v9 = vmax.f32 %v586_v2, 0.0  ;;  %v3066_v1 = vld [vmem:[%s3739_s6 + $0x8] sm:$0xff]  }
 0x1a2   : > { %v598_v8 = vmax.f32 %v588_v4, 0.0  ;;  %v3075_v5 = vsel %vm718_vm10, %v3066_v1, 0 }
 0x1a3   : > { %v599_v10 = vmax.f32 %v590_v6, 0.0 }
 0x1a4   : > { %v602_v11 = vpack.c.bf16 %v598_v8, %v596_v7 }
 0x1a5   : > { %v603_v12 = vpack.c.bf16 %v599_v10, %v597_v9 }
 0x1a7   : > { %739 = vmatprep.subr.bf16.mxu1 %v603_v12 }
 0x1a8   : > { %740 = vmatpush1.bf16.msra.mxu1 %v602_v11 }
 0x1ab   : > { %2488 = vmatmul.mubr.msk.bf16.vlgmr.msra.gmra.mrb[0].mxu1 %vm718_vm10, %v2650_v13 }
 0x1ac   : > { %779 = vmatprep.mubr.bf16.mxu1 %v2869_v33 }
 0x1b3   : > { %2489 = vmatmul.mubr.msk.bf16.gmra.mrb[4].mxu1 %vm718_vm10, %v2651_v14 }
 0x1b4   : > { %789 = vmatprep.mubr.bf16.mxu1 %v2869_v33 }
 0x1bb   : > { %2490 = vmatmul.mubr.msk.bf16.gmra.mrb[8].mxu1 %vm718_vm10, %v2652_v15 }
 0x1bc   : > { %799 = vmatprep.mubr.bf16.mxu1 %v2869_v33 }
 0x1c3   : > { %2491 = vmatmul.mubr.msk.bf16.gmra.mrb[12].mxu1 %vm718_vm10, %v2653_v16 }
 0x1c4   : > { %809 = vmatprep.mubr.bf16.mxu1 %v2869_v33 }
 0x1cb   : > { %2492 = vmatmul.mubr.msk.bf16.gmra.mrb[16].mxu1 %vm718_vm10, %v2656_v59 }
 0x1cc   : > { %819 = vmatprep.mubr.bf16.mxu1 %v2869_v33 }
 0x1d3   : > { %2493 = vmatmul.mubr.msk.bf16.gmra.mrb[20].mxu1 %vm718_vm10, %v2657_v60 }
 0x27e   : > { %v771_v18 = vpop.f32.mrb[0].mxu1 }
 0x27f   : > { %v772_v19 = vadd.f32 %v771_v18, %v3011_v17  ;;  %v3014_v20 = vpop.f32.mrb[1].mxu1 }
 0x280   : > { %v775_v21 = vpop.f32.mrb[2].mxu1 }
 0x281   : > { %v3016_v22 = vpop.f32.mrb[3].mxu1  ;;  %843 = vxpose.xlu0.b32.start [1/4] (short) %v772_v19, 128  ;;  %v776_v24 = vadd.f32 %v775_v21, %v3018_v23 }
 0x285   : > { %844 = vxpose.xlu0.b32.cont [2/4] (short) %v776_v24, 128 }
 0x286   : > { %v781_v26 = vpop.f32.mrb[4].mxu1 }
 0x287   : > { %v782_v27 = vadd.f32 %v781_v26, %v3021_v25  ;;  %v3024_v28 = vpop.f32.mrb[5].mxu1 }
 0x288   : > { %v785_v29 = vpop.f32.mrb[6].mxu1 }
 0x289   : > { %v3028_v31 = vpop.f32.mrb[7].mxu1  ;;  %845 = vxpose.xlu0.b32.cont [3/4] (short) %v782_v27, 128  ;;  %v786_v32 = vadd.f32 %v785_v29, %v3026_v30 }
 0x28d   : > { %846 = vxpose.xlu0.b32.end [4/4] (short) %v786_v32, 128 }
 0x28e   : > { %v791_v34 = vpop.f32.mrb[8].mxu1 }
 0x28f   : > { %v793_v36 = vpop.f32.mrb[9].mxu1  ;;  %v792_v39 = vadd.f32 %v791_v34, %v651_v37 }
 0x290   : > { %v795_v38 = vpop.f32.mrb[10].mxu1  ;;  %v794_v42 = vadd.f32 %v793_v36, %v651_v37 }
 0x291   : > { %v796_v40 = vadd.f32 %v795_v38, %v656_v35  ;;  %v797_v41 = vpop.f32.mrb[11].mxu1 }
 0x292   : > { %v798_v43 = vadd.f32 %v797_v41, %v656_v35 }
 0x293   : > { %v3031_v44 = vpack.c.bf16 %v796_v40, %v792_v39 }
 0x294   : > { %v3033_v45 = vpack.c.bf16 %v798_v43, %v794_v42 }
 0x296   : > { %v801_v46 = vpop.f32.mrb[12].mxu1  ;;  %935 = vmatprep.subr.bf16.mxu0 %v3033_v45 }
 0x297   : > { %v803_v48 = vpop.f32.mrb[13].mxu1  ;;  %936 = vmatpush1.bf16.msra.mxu0 %v3031_v44  ;;  %v802_v51 = vadd.f32 %v801_v46, %v661_v49 }
 0x298   : > { %v805_v50 = vpop.f32.mrb[14].mxu1  ;;  %v804_v54 = vadd.f32 %v803_v48, %v661_v49 }
 0x299   : > { %v806_v52 = vadd.f32 %v805_v50, %v666_v47  ;;  %v807_v53 = vpop.f32.mrb[15].mxu1 }
 0x29a   : > { %v808_v55 = vadd.f32 %v807_v53, %v666_v47 }
 0x29b   : > { %v3037_v56 = vpack.c.bf16 %v806_v52, %v802_v51  ;;  %v624_v52 = vld [vmem:[%s3738_s5 + $0x40] sm:$0xff] }
 0x29c   : > { %v3039_v57 = vpack.c.bf16 %v808_v55, %v804_v54 }
 0x29e   : > { %937 = vmatprep.subr.bf16.mxu0 %v3039_v57  ;;  %v3129_v60 = vpop.f32.mrb[16].mxu1 }
 0x29f   : > { %938 = vmatpush1.bf16.msra.mxu0 %v3037_v56 }
 0x2a0   : > { %2604 = vmatprep.subr.msk.bf16.mxu0 %vm718_vm10, %v3044_v58 }
 0x301   : > { %v859_v61 = vpop.trf.xlu0 }
 0x305   : > { %v860_v62 = vpop.trf.xlu0 }
 0x306   : > { %v907_v63 = vpack.c.bf16 %v860_v62, %v859_v61  ;;  %v3131_v61 = vpop.f32.mrb[17].mxu1 }
 0x307   : > { %v3133_v62 = vpop.f32.mrb[18].mxu1 }
 0x308   : > { %2494 = vmatmul.mubr.msk.bf16.vlgmr.msra.gmra.mrb[8].mxu0 %vm718_vm10, %v907_v63  ;;  %v3135_v63 = vpop.f32.mrb[19].mxu1 }
 0x309   : > { %2557 = vmatpush3.bf16.xpose.msra.mxu0 %v3061_v0  ;;  %v861_v2 = vpop.trf.xlu0  ;;  %977 = vmatprep.mubr.bf16.mxu0 %v2869_v33 }
 0x30a   : > { %2605 = vmatprep.subr.msk.bf16.mxu0 %vm718_vm10, %v3066_v1 }
 0x30d   : > { %v862_v3 = vpop.trf.xlu0 }
 0x30e   : > { %v908_v4 = vpack.c.bf16 %v862_v3, %v861_v2  ;;  %v627_v2 = vld [vmem:[%s3738_s5 + $0x58] sm:$0xff]  ;;  %v3140_v3 = vpop.f32.mrb[20].mxu1 }
 0x310   : > { %2495 = vmatmul.mubr.msk.bf16.gmra.mrb[12].mxu0 %vm718_vm10, %v908_v4  ;;  %v3142_v4 = vpop.f32.mrb[21].mxu1 }
 0x311   : > { %2559 = vmatpush3.bf16.xpose.msra.mxu0 %v3075_v5  ;;  %v863_v6 = vpop.trf.xlu0  ;;  %987 = vmatprep.mubr.bf16.mxu0 %v2869_v33 }
 0x312   : > { %1324 = vmatprep.subr.bf16.mxu0 %v3033_v45 }
 0x315   : > { %v864_v7 = vpop.trf.xlu0 }
 0x316   : > { %v909_v8 = vpack.c.bf16 %v864_v7, %v863_v6  ;;  %v3144_v6 = vpop.f32.mrb[22].mxu1 }
 0x317   : > { %v3146_v7 = vpop.f32.mrb[23].mxu1 }
 0x318   : > { %2496 = vmatmul.mubr.msk.bf16.gmra.mrb[16].mxu0 %vm718_vm10, %v909_v8  ;;  %v625_v8 = vld [vmem:[%s3738_s5 + $0x48] sm:$0xff] }
 0x319   : > { %v865_v9 = vpop.trf.xlu0  ;;  %997 = vmatprep.mubr.bf16.mxu0 %v2869_v33 }
 0x31d   : > { %v866_v10 = vpop.trf.xlu0 }
 0x31e   : > { %v910_v11 = vpack.c.bf16 %v866_v10, %v865_v9 }
 0x320   : > { %2497 = vmatmul.mubr.msk.bf16.gmra.mrb[20].mxu0 %vm718_vm10, %v910_v11 }
 0x321   : > { %v3084_v12 = vpop.trf.xlu0 }
 0x325   : > { %v3086_v13 = vpop.trf.xlu0 }
 0x329   : > { %v3090_v15 = vpop.trf.xlu0 }
 0x32d   : > { %v3092_v16 = vpop.trf.xlu0 }
 0x331   : > { %v3096_v19 = vpop.trf.xlu0 }
 0x335   : > { %v3098_v21 = vpop.trf.xlu0 }
 0x339   : > { %v3151_v10 = vpop.trf.xlu0 }
 0x3db   : > { %v969_v26 = vpop.f32.mrb[8].mxu0 }
 0x3dc   : > { %v971_v27 = vpop.f32.mrb[9].mxu0 }
 0x3dd   : > { %v973_v29 = vpop.f32.mrb[10].mxu0  ;;  %v1008_v32 = vmax.f32 %v969_v26, %v971_v27 }
 0x3de   : > { %v975_v34 = vpop.f32.mrb[11].mxu0 }
 0x3df   : > { %1009 = vmax.xlane.f32.xlu1 %v1008_v32  ;;  %v1011_v35 = vmax.f32 %v973_v29, %v975_v34 }
 0x3e3   : > { %1012 = vmax.xlane.f32.xlu1 %v1011_v35  ;;  %v979_v36 = vpop.f32.mrb[12].mxu0 }
 0x3e4   : > { %v981_v37 = vpop.f32.mrb[13].mxu0 }
 0x3e5   : > { %v983_v38 = vpop.f32.mrb[14].mxu0  ;;  %v1014_v39 = vmax.f32 %v979_v36, %v981_v37 }
 0x3e6   : > { %v985_v40 = vpop.f32.mrb[15].mxu0 }
 0x3e7   : > { %1015 = vmax.xlane.f32.xlu1 %v1014_v39  ;;  %v1017_v41 = vmax.f32 %v983_v38, %v985_v40 }
 0x3e9   : > { %1018 = vmax.xlane.f32.xlu0 %v1017_v41 }
 0x3eb   : > { %v3102_v42 = vpop.f32.mrb[16].mxu0 }
 0x3ec   : > { %v3104_v43 = vpop.f32.mrb[17].mxu0 }
 0x3ed   : > { %v3106_v46 = vpop.f32.mrb[18].mxu0  ;;  %v1020_v47 = vmax.f32 %v3102_v42, %v3104_v43 }
 0x3ee   : > { %v3110_v48 = vpop.f32.mrb[19].mxu0 }
 0x3ef   : > { %v1023_v49 = vmax.f32 %v3106_v46, %v3110_v48 }
 0x3f3   : > { %v3114_v50 = vpop.f32.mrb[20].mxu0 }
 0x3f4   : > { %v3116_v51 = vpop.f32.mrb[21].mxu0 }
 0x3f5   : > { %v3121_v53 = vpop.f32.mrb[22].mxu0  ;;  %v1026_v54 = vmax.f32 %v3114_v50, %v3116_v51 }
 0x3f6   : > { %v3125_v55 = vpop.f32.mrb[23].mxu0 }
 0x3f7   : > { %v1029_v59 = vmax.f32 %v3121_v53, %v3125_v55 }
 0x3f8   : > { %670 = vperm.xlu1 %2646, %v624_v52  }
 0x3ff   : > { %685 = vperm.xlu0 %2647, %v627_v2  }
 0x41c   : > { %1021 = vmax.xlane.f32.xlu1 %v1020_v47  ;;  %v3153_v47 = vpop.trf.xlu0 }
 0x420   : > { %1024 = vmax.xlane.f32.xlu1 %v1023_v49 }
 0x424   : > { %1027 = vmax.xlane.f32.xlu1 %v1026_v54 }
 0x428   : > { %1030 = vmax.xlane.f32.xlu1 %v1029_v59 }
 0x439   : > { %675 = vperm.xlu1 %2646, %v625_v8  }
 0x46c   : > { %v1010_v9 = vpop.xlane.xlu1 %1009 }
 0x46d   : > { %v1032_v11 = vsub.f32 %v969_v26, %v1010_v9  ;;  %v1033_v32 = vsub.f32 %v971_v27, %v1010_v9 }
 0x46f   : > { %v1048_v35 = vmul.f32 1.442695, %v1032_v11  ;;  %v1050_v39 = vmul.f32 1.442695, %v1033_v32 }
 0x470   : > { %v1013_v41 = vpop.xlane.xlu1 %1012 }
 0x471   : > { %2658 = vpow2.f32 %v1048_v35  ;;  %v1034_v52 = vsub.f32 %v973_v29, %v1013_v41  ;;  %v1035_v2 = vsub.f32 %v975_v34, %v1013_v41 }
 0x472   : > { %2660 = vpow2.f32 %v1050_v39 }
 0x473   : > { %v1052_v49 = vmul.f32 1.442695, %v1034_v52  ;;  %v1054_v54 = vmul.f32 1.442695, %v1035_v2  ;;  %v626_v52 = vld [vmem:[%s3738_s5 + $0x50] sm:$0xff] }
 0x474   : > { %v1016_v59 = vpop.xlane.xlu1 %1015 }
 0x475   : > { %2662 = vpow2.f32 %v1052_v49  ;;  %v1036_v24 = vsub.f32 %v979_v36, %v1016_v59  ;;  %v1037_v8 = vsub.f32 %v981_v37, %v1016_v59 }
 0x476   : > { %2664 = vpow2.f32 %v1054_v54  ;;  %v1019_v18 = vpop.xlane.xlu0 %1018 }
 0x477   : > { %v1056_v14 = vmul.f32 1.442695, %v1036_v24  ;;  %v1058_v26 = vmul.f32 1.442695, %v1037_v8  ;;  %v1038_v27 = vsub.f32 %v983_v38, %v1019_v18  ;;  %v1039_v9 = vsub.f32 %v985_v40, %v1019_v18 }
 0x478   : > { %v671_v2 = vpop.permute.xlu1 %670 }
 0x479   : > { %2666 = vpow2.f32 %v1056_v14  ;;  %v1060_v11 = vmul.f32 1.442695, %v1038_v27  ;;  %v1062_v32 = vmul.f32 1.442695, %v1039_v9 }
 0x47a   : > { %2668 = vpow2.f32 %v1058_v26 }
 0x47b   : > { %v3155_v29 = vpop.eup %2658  ;;  %2670 = vpow2.f32 %v1060_v11 }
 0x47c   : > { %v3157_v34 = vpop.eup %2660  ;;  %2672 = vpow2.f32 %v1062_v32 }
 0x47d   : > { %v1080_v36 = vadd.f32 %v3157_v34, %v3155_v29 }
 0x47f   : > { %v3161_v37 = vpop.eup %2662  ;;  %1081 = vadd.xlane.f32.xlu1 %v1080_v36 }
 0x480   : > { %v3163_v24 = vpop.eup %2664 }
 0x481   : > { %v1083_v14 = vadd.f32 %v3163_v24, %v3161_v37 }
 0x483   : > { %v3167_v18 = vpop.eup %2666  ;;  %1084 = vadd.xlane.f32.xlu1 %v1083_v14 }
 0x484   : > { %v3169_v38 = vpop.eup %2668 }
 0x485   : > { %v3171_v40 = vpop.eup %2670  ;;  %v1086_v35 = vadd.f32 %v3169_v38, %v3167_v18 }
 0x486   : > { %v3175_v39 = vpop.eup %2672 }
 0x487   : > { %1087 = vadd.xlane.f32.xlu1 %v1086_v35  ;;  %v1089_v41 = vadd.f32 %v3175_v39, %v3171_v40 }
 0x48b   : > { %1090 = vadd.xlane.f32.xlu1 %v1089_v41 }
 0x49c   : > { %680 = vperm.xlu1 %2646, %v626_v52  }
 0x4a9   : > { %v1022_v49 = vpop.xlane.xlu1 %1021 }
 0x4aa   : > { %v1040_v54 = vsub.f32 %v3102_v42, %v1022_v49  ;;  %v1041_v59 = vsub.f32 %v3104_v43, %v1022_v49 }
 0x4ac   : > { %v1064_v8 = vmul.f32 1.442695, %v1040_v54  ;;  %v1066_v26 = vmul.f32 1.442695, %v1041_v59  ;;  %v812_v59 = vadd.f32 %v3129_v60, %v671_v2 }
 0x4ad   : > { %v1025_v27 = vpop.xlane.xlu1 %1024 }
 0x4ae   : > { %v1042_v9 = vsub.f32 %v3106_v46, %v1025_v27  ;;  %v1043_v11 = vsub.f32 %v3110_v48, %v1025_v27  ;;  %2674 = vpow2.f32 %v1064_v8 }
 0x4af   : > { %2676 = vpow2.f32 %v1066_v26 }
 0x4b0   : > { %v1068_v32 = vmul.f32 1.442695, %v1042_v9  ;;  %v1070_v36 = vmul.f32 1.442695, %v1043_v11 }
 0x4b1   : > { %v1028_v14 = vpop.xlane.xlu1 %1027 }
 0x4b2   : > { %2678 = vpow2.f32 %v1068_v32  ;;  %v1044_v35 = vsub.f32 %v3114_v50, %v1028_v14  ;;  %v1045_v41 = vsub.f32 %v3116_v51, %v1028_v14  ;;  %v814_v50 = vadd.f32 %v3131_v61, %v671_v2 }
 0x4b3   : > { %2680 = vpow2.f32 %v1070_v36 }
 0x4b4   : > { %v1072_v42 = vmul.f32 1.442695, %v1044_v35  ;;  %v1074_v43 = vmul.f32 1.442695, %v1045_v41 }
 0x4b5   : > { %v1031_v52 = vpop.xlane.xlu1 %1030 }
 0x4b6   : > { %2682 = vpow2.f32 %v1072_v42  ;;  %v1046_v49 = vsub.f32 %v3121_v53, %v1031_v52  ;;  %v1047_v46 = vsub.f32 %v3125_v55, %v1031_v52 }
 0x4b7   : > { %2684 = vpow2.f32 %v1074_v43 }
 0x4b8   : > { %v1076_v48 = vmul.f32 1.442695, %v1046_v49  ;;  %v1078_v54 = vmul.f32 1.442695, %v1047_v46  ;;  %v3191_v26 = vpop.eup %2674  ;;  %v686_v46 = vpop.permute.xlu0 %685 }
 0x4b9   : > { %v676_v8 = vpop.permute.xlu1 %675  ;;  %v3196_v9 = vpop.eup %2676 }
 0x4ba   : > { %2686 = vpow2.f32 %v1076_v48  ;;  %v816_v51 = vadd.f32 %v3133_v62, %v676_v8  ;;  %v818_v27 = vadd.f32 %v3135_v63, %v676_v8  ;;  %v1092_v62 = vadd.f32 %v3196_v9, %v3191_v26 }
 0x4bb   : > { %2688 = vpow2.f32 %v1078_v54 }
 0x4bc   : > { %v3198_v53 = vpop.eup %2678  ;;  %v3200_v55 = vpack.c.bf16 %v816_v51, %v812_v59  ;;  %v3202_v11 = vpack.c.bf16 %v818_v27, %v814_v50  ;;  %v826_v50 = vadd.f32 %v3144_v6, %v686_v46  ;;  %v828_v51 = vadd.f32 %v3146_v7, %v686_v46 }
 0x4bd   : > { %v3204_v60 = vpop.eup %2680 }
 0x4be   : > { %1136 = vmatprep.subr.bf16.mxu1 %v3202_v11  ;;  %v1095_v61 = vadd.f32 %v3204_v60, %v3198_v53 }
 0x4bf   : > { %1137 = vmatpush1.bf16.xpose.msra.mxu1 %v3200_v55 }
 0x4c0   : > { %v3212_v63 = vpop.eup %2682  ;;  %1096 = vadd.xlane.f32.xlu0 %v1095_v61  ;;  %1093 = vadd.xlane.f32.xlu1 %v1092_v62 }
 0x4c1   : > { %v3214_v2 = vpop.eup %2684 }
 0x4c2   : > { %v1098_v32 = vadd.f32 %v3214_v2, %v3212_v63 }
 0x4c4   : > { %v3218_v36 = vpop.eup %2686  ;;  %1099 = vadd.xlane.f32.xlu1 %v1098_v32 }
 0x4c5   : > { %v3220_v14 = vpop.eup %2688 }
 0x4c6   : > { %v1101_v35 = vadd.f32 %v3220_v14, %v3218_v36 }
 0x4c8   : > { %1102 = vadd.xlane.f32.xlu1 %v1101_v35 }
 0x50c   : > { %v1082_v41 = vpop.xlane.xlu1 %1081 }
 0x50d   : > { %2690 = vrcp.f32 %v1082_v41 }
 0x510   : > { %v1085_v42 = vpop.xlane.xlu1 %1084 }
 0x511   : > { %2692 = vrcp.f32 %v1085_v42 }
 0x514   : > { %v1088_v43 = vpop.xlane.xlu1 %1087 }
 0x515   : > { %2694 = vrcp.f32 %v1088_v43 }
 0x517   : > { %v2691_v49 = vpop.eup %2690 }
 0x518   : > { %v1091_v52 = vpop.xlane.xlu1 %1090  ;;  %v1113_v59 = vmul.f32 %v2691_v49, %v3157_v34 }
 0x519   : > { %2696 = vrcp.f32 %v1091_v52 }
 0x51b   : > { %v2693_v48 = vpop.eup %2692 }
 0x51c   : > { %v681_v54 = vpop.permute.xlu1 %680  ;;  %v1115_v8 = vmul.f32 %v2693_v48, %v3163_v24  ;;  %v1114_v6 = vmul.f32 %v2693_v48, %v3161_v37 }
 0x51d   : > { %v822_v27 = vadd.f32 %v3140_v3, %v681_v54  ;;  %v824_v61 = vadd.f32 %v3142_v4, %v681_v54  ;;  %v1112_v4 = vmul.f32 %v2691_v49, %v3155_v29 }
 0x51e   : > { %v1129_v62 = vpack.c.bf16 %v1115_v8, %v1113_v59 }
 0x51f   : > { %v3230_v32 = vpack.c.bf16 %v826_v50, %v822_v27  ;;  %v3232_v35 = vpack.c.bf16 %v828_v51, %v824_v61  ;;  %v2695_v41 = vpop.eup %2694  ;;  %v1128_v24 = vpack.c.bf16 %v1114_v6, %v1112_v4 }
 0x520   : > { %1168 = vmatprep.mubr.bf16.mxu1 %v1129_v62  ;;  %v1117_v7 = vmul.f32 %v2695_v41, %v3169_v38  ;;  %v1116_v37 = vmul.f32 %v2695_v41, %v3167_v18 }
 0x521   : > { %1138 = vmatprep.subr.bf16.mxu1 %v3232_v35 }
 0x522   : > { %1139 = vmatpush1.bf16.xpose.msra.mxu1 %v3230_v32 }
 0x523   : > { %v2697_v34 = vpop.eup %2696  ;;  %1525 = vmatprep.subr.bf16.mxu1 %v3202_v11 }
 0x524   : > { %v1119_v3 = vmul.f32 %v2697_v34, %v3175_v39  ;;  %v1118_v43 = vmul.f32 %v2697_v34, %v3171_v40 }
 0x526   : > { %v1131_v42 = vpack.c.bf16 %v1119_v3, %v1117_v7  ;;  %v1130_v52 = vpack.c.bf16 %v1118_v43, %v1116_v37 }
 0x529   : > { %1169 = vmatmul.mubr.bf16.vlgmr.msra.gmra.mrb[24].mxu1 %v1128_v24 }
 0x52a   : > { %1176 = vmatprep.mubr.bf16.mxu1 %v1131_v42  ;;  %1526 = vmatpush1.bf16.xpose.msra.mxu1 %v3200_v55 }
 0x52b   : > { %1527 = vmatprep.subr.bf16.mxu1 %v3232_v35 }
 0x531   : > { %1177 = vmatmul.mubr.bf16.gmra.mrb[28].mxu1 %v1130_v52 }
 0x532   : > { %1528 = vmatpush1.bf16.xpose.msra.mxu1 %v3230_v32 }
 0x533   : > { %1691 = vmatprep.subr.bf16.mxu1 %v3033_v45 }
 0x54d   : > { %v1094_v29 = vpop.xlane.xlu1 %1093  ;;  %v1097_v38 = vpop.xlane.xlu0 %1096 }
 0x54e   : > { %2698 = vrcp.f32 %v1094_v29 }
 0x54f   : > { %2700 = vrcp.f32 %v1097_v38 }
 0x551   : > { %v1100_v39 = vpop.xlane.xlu1 %1099 }
 0x552   : > { %2702 = vrcp.f32 %v1100_v39 }
 0x555   : > { %v1103_v49 = vpop.xlane.xlu1 %1102 }
 0x556   : > { %2704 = vrcp.f32 %v1103_v49 }
 0x558   : > { %v2699_v46 = vpop.eup %2698 }
 0x559   : > { %v2701_v48 = vpop.eup %2700  ;;  %v1121_v40 = vmul.f32 %v2699_v46, %v3196_v9  ;;  %v1120_v18 = vmul.f32 %v2699_v46, %v3191_v26 }
 0x55a   : > { %v1123_v54 = vmul.f32 %v2701_v48, %v3204_v60  ;;  %v1122_v59 = vmul.f32 %v2701_v48, %v3198_v53  ;;  %v3742_v48 = vpack.c.bf16 %v3086_v13, %v3084_v12  ;;  %v3744_v12 = vpack.c.bf16 %v3098_v21, %v3096_v19  ;;  %v3292_v13 = vld [vmem:[%s3740_s7] ss:$0 sm:$0xff] }
 0x55c   : > { %v1133_v8 = vpack.c.bf16 %v1123_v54, %v1121_v40  ;;  %v1132_v50 = vpack.c.bf16 %v1122_v59, %v1120_v18  ;;  %v2703_v51 = vpop.eup %2702  ;;  %v3743_v40 = vpack.c.bf16 %v3092_v16, %v3090_v15 }
 0x55d   : > { %v1125_v61 = vmul.f32 %v2703_v51, %v3214_v2  ;;  %v1124_v41 = vmul.f32 %v2703_v51, %v3212_v63 }
 0x55e   : > { %1184 = vmatprep.mubr.bf16.mxu1 %v1133_v8 }
 0x55f   : > { %1185 = vmatmul.mubr.bf16.gmra.mrb[32].mxu1 %v1132_v50 }
 0x560   : > { %v2705_v27 = vpop.eup %2704 }
 0x561   : > { %v1127_v62 = vmul.f32 %v2705_v27, %v3220_v14  ;;  %v1126_v9 = vmul.f32 %v2705_v27, %v3218_v36 }
 0x563   : > { %v1135_v34 = vpack.c.bf16 %v1127_v62, %v1125_v61  ;;  %v1134_v26 = vpack.c.bf16 %v1126_v9, %v1124_v41 }
 0x565   : > { %1192 = vmatprep.mubr.bf16.mxu1 %v1135_v34 }
 0x567   : > { %1193 = vmatmul.mubr.bf16.gmra.mrb[36].mxu1 %v1134_v26 }
 0x5fc   : > { %v1170_v60 = vpop.f32.mrb[24].mxu1 }
 0x5fd   : > { %v1172_v53 = vpop.f32.mrb[25].mxu1 }
 0x5fe   : > { %v1173_v6 = vpop.f32.mrb[26].mxu1 }
 0x5ff   : > { %v1201_v3 = vpack.c.bf16 %v1173_v6, %v1170_v60  ;;  %v1175_v4 = vpop.f32.mrb[27].mxu1 }
 0x601   : > { %2560 = vmatprep.mubr.msk.bf16.mxu0 %vm718_vm10, %v1201_v3 }
 0x604   : > { %v1178_v7 = vpop.f32.mrb[28].mxu1 }
 0x605   : > { %v1180_v24 = vpop.f32.mrb[29].mxu1 }
 0x606   : > { %v1181_v2 = vpop.f32.mrb[30].mxu1 }
 0x607   : > { %v1202_v42 = vpack.c.bf16 %v1181_v2, %v1178_v7  ;;  %v1183_v14 = vpop.f32.mrb[31].mxu1 }
 0x609   : > { %2561 = vmatmul.mubr.msk.bf16.vlgmr.msra.gmra.mrb[24].mxu0 %vm718_vm10, %v1202_v42 }
 0x60a   : > { %1325 = vmatpush1.bf16.msra.mxu0 %v3031_v44 }
 0x60b   : > { %1326 = vmatprep.subr.bf16.mxu0 %v3039_v57 }
 0x60e   : > { %1327 = vmatpush1.bf16.msra.mxu0 %v3037_v56 }
 0x60f   : > { %2606 = vmatprep.subr.msk.bf16.mxu0 %vm718_vm10, %v3044_v58 }
 0x632   : > { %v1186_v63 = vpop.f32.mrb[32].mxu1 }
 0x633   : > { %v1188_v36 = vpop.f32.mrb[33].mxu1 }
 0x634   : > { %v1189_v43 = vpop.f32.mrb[34].mxu1 }
 0x635   : > { %v1203_v37 = vpack.c.bf16 %v1189_v43, %v1186_v63  ;;  %v1191_v52 = vpop.f32.mrb[35].mxu1 }
 0x637   : > { %2564 = vmatprep.mubr.msk.bf16.mxu0 %vm718_vm10, %v1203_v37 }
 0x63a   : > { %v1194_v29 = vpop.f32.mrb[36].mxu1 }
 0x63b   : > { %v1196_v38 = vpop.f32.mrb[37].mxu1 }
 0x63c   : > { %v1197_v39 = vpop.f32.mrb[38].mxu1 }
 0x63d   : > { %v1204_v49 = vpack.c.bf16 %v1197_v39, %v1194_v29  ;;  %v1199_v46 = vpop.f32.mrb[39].mxu1 }
 0x63f   : > { %2565 = vmatmul.mubr.msk.bf16.gmra.mrb[28].mxu0 %vm718_vm10, %v1204_v49 }
 0x640   : > { %1356 = vmatprep.mubr.bf16.mxu0 %v2869_v33 }
 0x647   : > { %2505 = vmatmul.mubr.msk.bf16.vlgmr.msra.gmra.mrb[32].mxu0 %vm718_vm10, %v3742_v48 }
 0x648   : > { %2569 = vmatpush3.bf16.xpose.msra.mxu0 %v3061_v0  ;;  %1366 = vmatprep.mubr.bf16.mxu0 %v2869_v33 }
 0x649   : > { %2607 = vmatprep.subr.msk.bf16.mxu0 %vm718_vm10, %v3066_v1  ;;  %v914_v1 = vpack.c.bf16 %v3153_v47, %v3151_v10 }
 0x64f   : > { %2506 = vmatmul.mubr.msk.bf16.gmra.mrb[36].mxu0 %vm718_vm10, %v3743_v40 }
 0x650   : > { %2571 = vmatpush3.bf16.xpose.msra.mxu0 %v3075_v5  ;;  %1376 = vmatprep.mubr.bf16.mxu0 %v2869_v33 }
 0x651   : > { %1892 = vmatprep.subr.bf16.mxu0 %v3202_v11 }
 0x657   : > { %2507 = vmatmul.mubr.msk.bf16.gmra.mrb[40].mxu0 %vm718_vm10, %v3744_v12 }
 0x658   : > { %1386 = vmatprep.mubr.bf16.mxu0 %v2869_v33 }
 0x65f   : > { %2508 = vmatmul.mubr.msk.bf16.gmra.mrb[44].mxu0 %vm718_vm10, %v914_v1 }
 0x6dc   : > { %v2562_v15 = vpop.f32.mrb[24].mxu0 }
 0x6dd   : > { %v1282_v16 = vadd.f32 %v2562_v15, %v3292_v13  ;;  %v1273_v19 = vpop.f32.mrb[25].mxu0 }
 0x6de   : > { %v1274_v21 = vadd.f32 %v3292_v13, %v1273_v19  ;;  %v2563_v10 = vpop.f32.mrb[26].mxu0 }
 0x6df   : > { %1306 = vst.msk [vmem:[%s3297_s20 + $0x10] sm:$0xff] %vm718_vm10, %v1282_v16  ;;  %v1285_v47 = vadd.f32 %v2563_v10, %v3292_v13  ;;  %v1276_v18 = vpop.f32.mrb[27].mxu0 }
 0x6e0   : > { %1304 = vst.msk [vmem:[%s3297_s20] sm:$0xff] %vm718_vm10, %v1274_v21  ;;  %v1277_v54 = vadd.f32 %v3292_v13, %v1276_v18 }
 0x6e1   : > { %1307 = vst.msk [vmem:[%s3297_s20 + $0x18] sm:$0xff] %vm718_vm10, %v1285_v47 }
 0x6e2   : > { %1305 = vst.msk [vmem:[%s3297_s20 + $0x8] sm:$0xff] %vm718_vm10, %v1277_v54 }
 0x712   : > { %v2566_v59 = vpop.f32.mrb[28].mxu0 }
 0x713   : > { %v1298_v8 = vadd.f32 %v2566_v59, %v3292_v13  ;;  %v1289_v50 = vpop.f32.mrb[29].mxu0 }
 0x714   : > { %v1290_v51 = vadd.f32 %v3292_v13, %v1289_v50  ;;  %v2567_v27 = vpop.f32.mrb[30].mxu0 }
 0x715   : > { %1310 = vst.msk [vmem:[%s3297_s20 + $0x30] sm:$0xff] %vm718_vm10, %v1298_v8  ;;  %v1301_v61 = vadd.f32 %v2567_v27, %v3292_v13  ;;  %v1292_v62 = vpop.f32.mrb[31].mxu0 }
 0x716   : > { %1308 = vst.msk [vmem:[%s3297_s20 + $0x20] sm:$0xff] %vm718_vm10, %v1290_v51  ;;  %v1293_v41 = vadd.f32 %v3292_v13, %v1292_v62 }
 0x717   : > { %1311 = vst.msk [vmem:[%s3297_s20 + $0x38] sm:$0xff] %vm718_vm10, %v1301_v61 }
 0x718   : > { %1309 = vst.msk [vmem:[%s3297_s20 + $0x28] sm:$0xff] %vm718_vm10, %v1293_v41 }
 0x71a   : > { %v1358_v9 = vpop.f32.mrb[32].mxu0 }
 0x71b   : > { %v1360_v34 = vpop.f32.mrb[33].mxu0 }
 0x71c   : > { %v1362_v26 = vpop.f32.mrb[34].mxu0  ;;  %v1397_v60 = vmax.f32 %v1358_v9, %v1360_v34 }
 0x71d   : > { %v1364_v53 = vpop.f32.mrb[35].mxu0 }
 0x71e   : > { %1398 = vmax.xlane.f32.xlu0 %v1397_v60  ;;  %v1400_v6 = vmax.f32 %v1362_v26, %v1364_v53 }
 0x720   : > { %1401 = vmax.xlane.f32.xlu1 %v1400_v6 }
 0x722   : > { %v1368_v3 = vpop.f32.mrb[36].mxu0 }
 0x723   : > { %v1370_v4 = vpop.f32.mrb[37].mxu0 }
 0x724   : > { %v1372_v7 = vpop.f32.mrb[38].mxu0  ;;  %v1403_v24 = vmax.f32 %v1368_v3, %v1370_v4 }
 0x725   : > { %v1374_v2 = vpop.f32.mrb[39].mxu0 }
 0x726   : > { %1404 = vmax.xlane.f32.xlu0 %v1403_v24  ;;  %v1406_v42 = vmax.f32 %v1372_v7, %v1374_v2 }
 0x728   : > { %1407 = vmax.xlane.f32.xlu1 %v1406_v42 }
 0x72a   : > { %v1378_v14 = vpop.f32.mrb[40].mxu0 }
 0x72b   : > { %v1380_v63 = vpop.f32.mrb[41].mxu0 }
 0x72c   : > { %v1382_v36 = vpop.f32.mrb[42].mxu0  ;;  %v1409_v43 = vmax.f32 %v1378_v14, %v1380_v63 }
 0x72d   : > { %v1384_v37 = vpop.f32.mrb[43].mxu0 }
 0x72e   : > { %1410 = vmax.xlane.f32.xlu0 %v1409_v43  ;;  %v1412_v52 = vmax.f32 %v1382_v36, %v1384_v37 }
 0x730   : > { %1413 = vmax.xlane.f32.xlu1 %v1412_v52 }
 0x732   : > { %v3323_v29 = vpop.f32.mrb[44].mxu0 }
 0x733   : > { %v3325_v38 = vpop.f32.mrb[45].mxu0 }
 0x734   : > { %v3327_v39 = vpop.f32.mrb[46].mxu0  ;;  %v1415_v49 = vmax.f32 %v3323_v29, %v3325_v38 }
 0x735   : > { %v3331_v46 = vpop.f32.mrb[47].mxu0 }
 0x736   : > { %1416 = vmax.xlane.f32.xlu0 %v1415_v49  ;;  %v1418_v48 = vmax.f32 %v3327_v39, %v3331_v46 }
 0x738   : > { %1419 = vmax.xlane.f32.xlu1 %v1418_v48 }
 0x7ab   : > { %v1399_v40 = vpop.xlane.xlu0 %1398 }
 0x7ac   : > { %v1421_v12 = vsub.f32 %v1358_v9, %v1399_v40  ;;  %v1422_v1 = vsub.f32 %v1360_v34, %v1399_v40 }
 0x7ad   : > { %v1402_v15 = vpop.xlane.xlu1 %1401 }
 0x7ae   : > { %v1437_v16 = vmul.f32 1.442695, %v1421_v12  ;;  %v1439_v19 = vmul.f32 1.442695, %v1422_v1  ;;  %v1423_v21 = vsub.f32 %v1362_v26, %v1402_v15  ;;  %v1424_v10 = vsub.f32 %v1364_v53, %v1402_v15 }
 0x7b0   : > { %2706 = vpow2.f32 %v1437_v16  ;;  %v1441_v47 = vmul.f32 1.442695, %v1423_v21  ;;  %v1443_v18 = vmul.f32 1.442695, %v1424_v10 }
 0x7b1   : > { %2708 = vpow2.f32 %v1439_v19 }
 0x7b2   : > { %2710 = vpow2.f32 %v1441_v47 }
 0x7b3   : > { %2712 = vpow2.f32 %v1443_v18  ;;  %v1405_v54 = vpop.xlane.xlu0 %1404 }
 0x7b4   : > { %v1425_v59 = vsub.f32 %v1368_v3, %v1405_v54  ;;  %v1426_v8 = vsub.f32 %v1370_v4, %v1405_v54 }
 0x7b5   : > { %v1408_v50 = vpop.xlane.xlu1 %1407 }
 0x7b6   : > { %v1445_v51 = vmul.f32 1.442695, %v1425_v59  ;;  %v1447_v27 = vmul.f32 1.442695, %v1426_v8  ;;  %v1427_v61 = vsub.f32 %v1372_v7, %v1408_v50  ;;  %v1428_v62 = vsub.f32 %v1374_v2, %v1408_v50 }
 0x7b8   : > { %2714 = vpow2.f32 %v1445_v51  ;;  %v1449_v41 = vmul.f32 1.442695, %v1427_v61  ;;  %v1451_v9 = vmul.f32 1.442695, %v1428_v62 }
 0x7b9   : > { %2716 = vpow2.f32 %v1447_v27 }
 0x7ba   : > { %v3335_v34 = vpop.eup %2706  ;;  %2718 = vpow2.f32 %v1449_v41 }
 0x7bb   : > { %v3337_v26 = vpop.eup %2708  ;;  %2720 = vpow2.f32 %v1451_v9  ;;  %v1411_v60 = vpop.xlane.xlu0 %1410 }
 0x7bc   : > { %v3339_v53 = vpop.eup %2710  ;;  %v1429_v6 = vsub.f32 %v1378_v14, %v1411_v60  ;;  %v1430_v3 = vsub.f32 %v1380_v63, %v1411_v60  ;;  %v1469_v4 = vadd.f32 %v3337_v26, %v3335_v34 }
 0x7bd   : > { %v3343_v7 = vpop.eup %2712  ;;  %v1414_v24 = vpop.xlane.xlu1 %1413 }
 0x7be   : > { %v1453_v2 = vmul.f32 1.442695, %v1429_v6  ;;  %v1455_v42 = vmul.f32 1.442695, %v1430_v3  ;;  %v1431_v43 = vsub.f32 %v1382_v36, %v1414_v24  ;;  %v1432_v52 = vsub.f32 %v1384_v37, %v1414_v24  ;;  %1470 = vadd.xlane.f32.xlu0 %v1469_v4 }
 0x7bf   : > { %v1472_v49 = vadd.f32 %v3343_v7, %v3339_v53  ;;  %v774_v6 = vadd.f32 %v3014_v20, %v3011_v17  ;;  %v778_v3 = vadd.f32 %v3016_v22, %v3018_v23  ;;  %v784_v4 = vadd.f32 %v3024_v28, %v3021_v25 }
 0x7c0   : > { %2722 = vpow2.f32 %v1453_v2  ;;  %v1457_v48 = vmul.f32 1.442695, %v1431_v43  ;;  %v1459_v40 = vmul.f32 1.442695, %v1432_v52  ;;  %v788_v24 = vadd.f32 %v3028_v31, %v3026_v30 }
 0x7c1   : > { %2724 = vpow2.f32 %v1455_v42  ;;  %1473 = vadd.xlane.f32.xlu1 %v1472_v49 }
 0x7c2   : > { %v3347_v14 = vpop.eup %2714  ;;  %2726 = vpow2.f32 %v1457_v48 }
 0x7c3   : > { %v3349_v63 = vpop.eup %2716  ;;  %2728 = vpow2.f32 %v1459_v40  ;;  %v1417_v12 = vpop.xlane.xlu0 %1416 }
 0x7c4   : > { %v3351_v1 = vpop.eup %2718  ;;  %v1433_v36 = vsub.f32 %v3323_v29, %v1417_v12  ;;  %v1434_v37 = vsub.f32 %v3325_v38, %v1417_v12  ;;  %v1475_v15 = vadd.f32 %v3349_v63, %v3347_v14 }
 0x7c5   : > { %v3357_v16 = vpop.eup %2720  ;;  %v1420_v19 = vpop.xlane.xlu1 %1419 }
 0x7c6   : > { %v1461_v21 = vmul.f32 1.442695, %v1433_v36  ;;  %v1463_v10 = vmul.f32 1.442695, %v1434_v37  ;;  %1476 = vadd.xlane.f32.xlu0 %v1475_v15  ;;  %v1435_v47 = vsub.f32 %v3327_v39, %v1420_v19  ;;  %v1436_v18 = vsub.f32 %v3331_v46, %v1420_v19 }
 0x7c7   : > { %v1478_v54 = vadd.f32 %v3357_v16, %v3351_v1 }
 0x7c8   : > { %2730 = vpow2.f32 %v1461_v21  ;;  %v1465_v29 = vmul.f32 1.442695, %v1435_v47  ;;  %v1467_v59 = vmul.f32 1.442695, %v1436_v18 }
 0x7c9   : > { %2732 = vpow2.f32 %v1463_v10  ;;  %1479 = vadd.xlane.f32.xlu1 %v1478_v54 }
 0x7ca   : > { %v3363_v38 = vpop.eup %2722  ;;  %2734 = vpow2.f32 %v1465_v29 }
 0x7cb   : > { %v3365_v8 = vpop.eup %2724  ;;  %2736 = vpow2.f32 %v1467_v59 }
 0x7cc   : > { %v3367_v50 = vpop.eup %2726  ;;  %v1481_v39 = vadd.f32 %v3365_v8, %v3363_v38 }
 0x7cd   : > { %v3371_v46 = vpop.eup %2728 }
 0x7ce   : > { %1482 = vadd.xlane.f32.xlu0 %v1481_v39  ;;  %v1484_v51 = vadd.f32 %v3371_v46, %v3367_v50 }
 0x7d0   : > { %1485 = vadd.xlane.f32.xlu1 %v1484_v51 }
 0x7d2   : > { %v3375_v27 = vpop.eup %2730 }
 0x7d3   : > { %v3377_v61 = vpop.eup %2732 }
 0x7d4   : > { %v3379_v62 = vpop.eup %2734  ;;  %v1487_v41 = vadd.f32 %v3377_v61, %v3375_v27 }
 0x7d5   : > { %v3383_v9 = vpop.eup %2736 }
 0x7d6   : > { %1488 = vadd.xlane.f32.xlu0 %v1487_v41  ;;  %v1490_v60 = vadd.f32 %v3383_v9, %v3379_v62 }
 0x7d8   : > { %1491 = vadd.xlane.f32.xlu1 %v1490_v60 }
 0x803   : > { %875 = vxpose.xlu0.b32.start [1/4] (short) %v774_v6, 128 }
 0x807   : > { %876 = vxpose.xlu0.b32.cont [2/4] (short) %v778_v3, 128 }
 0x80b   : > { %877 = vxpose.xlu0.b32.cont [3/4] (short) %v784_v4, 128 }
 0x80f   : > { %878 = vxpose.xlu0.b32.end [4/4] (short) %v788_v24, 128 }
 0x84b   : > { %v1471_v2 = vpop.xlane.xlu0 %1470 }
 0x84c   : > { %2738 = vrcp.f32 %v1471_v2 }
 0x84e   : > { %v1474_v42 = vpop.xlane.xlu1 %1473 }
 0x84f   : > { %2740 = vrcp.f32 %v1474_v42 }
 0x853   : > { %v1477_v43 = vpop.xlane.xlu0 %1476 }
 0x854   : > { %2742 = vrcp.f32 %v1477_v43 }
 0x856   : > { %v1480_v17 = vpop.xlane.xlu1 %1479  ;;  %v2739_v20 = vpop.eup %2738 }
 0x857   : > { %2744 = vrcp.f32 %v1480_v17  ;;  %v1501_v22 = vmul.f32 %v2739_v20, %v3335_v34  ;;  %v1502_v25 = vmul.f32 %v2739_v20, %v3337_v26 }
 0x859   : > { %v2741_v52 = vpop.eup %2740 }
 0x85a   : > { %v1503_v23 = vmul.f32 %v2741_v52, %v3339_v53  ;;  %v1504_v28 = vmul.f32 %v2741_v52, %v3343_v7 }
 0x85b   : > { %v1483_v30 = vpop.xlane.xlu0 %1482 }
 0x85c   : > { %2746 = vrcp.f32 %v1483_v30  ;;  %v1518_v31 = vpack.c.bf16 %v1504_v28, %v1502_v25  ;;  %v1517_v49 = vpack.c.bf16 %v1503_v23, %v1501_v22 }
 0x85d   : > { %v1486_v48 = vpop.xlane.xlu1 %1485 }
 0x85e   : > { %1557 = vmatprep.mubr.bf16.mxu1 %v1518_v31  ;;  %2748 = vrcp.f32 %v1486_v48  ;;  %v2743_v40 = vpop.eup %2742 }
 0x85f   : > { %1558 = vmatmul.mubr.bf16.vlgmr.msra.gmra.mrb[40].mxu1 %v1517_v49  ;;  %v1506_v34 = vmul.f32 %v2743_v40, %v3349_v63  ;;  %v1505_v53 = vmul.f32 %v2743_v40, %v3347_v14 }
 0x860   : > { %1692 = vmatpush1.bf16.msra.mxu1 %v3031_v44 }
 0x861   : > { %v2745_v12 = vpop.eup %2744  ;;  %1693 = vmatprep.subr.bf16.mxu1 %v3039_v57 }
 0x862   : > { %v1508_v26 = vmul.f32 %v2745_v12, %v3357_v16  ;;  %v1507_v7 = vmul.f32 %v2745_v12, %v3351_v1 }
 0x863   : > { %v1489_v36 = vpop.xlane.xlu0 %1488 }
 0x864   : > { %1694 = vmatpush1.bf16.msra.mxu1 %v3037_v56  ;;  %2750 = vrcp.f32 %v1489_v36  ;;  %v1520_v37 = vpack.c.bf16 %v1508_v26, %v1506_v34  ;;  %v1519_v15 = vpack.c.bf16 %v1507_v7, %v1505_v53 }
 0x865   : > { %v1492_v19 = vpop.xlane.xlu1 %1491  ;;  %2608 = vmatprep.subr.msk.bf16.mxu1 %vm718_vm10, %v3044_v58 }
 0x866   : > { %v2747_v21 = vpop.eup %2746  ;;  %1565 = vmatprep.mubr.bf16.mxu1 %v1520_v37  ;;  %2752 = vrcp.f32 %v1492_v19 }
 0x867   : > { %1566 = vmatmul.mubr.bf16.gmra.mrb[44].mxu1 %v1519_v15  ;;  %v1510_v16 = vmul.f32 %v2747_v21, %v3365_v8  ;;  %v1509_v1 = vmul.f32 %v2747_v21, %v3363_v38 }
 0x868   : > { %v2749_v63 = vpop.eup %2748 }
 0x869   : > { %v1512_v14 = vmul.f32 %v2749_v63, %v3371_v46  ;;  %v1511_v10 = vmul.f32 %v2749_v63, %v3367_v50 }
 0x86b   : > { %v1522_v47 = vpack.c.bf16 %v1512_v14, %v1510_v16  ;;  %v1521_v18 = vpack.c.bf16 %v1511_v10, %v1509_v1 }
 0x86d   : > { %1573 = vmatprep.mubr.bf16.mxu1 %v1522_v47 }
 0x86e   : > { %v2751_v54 = vpop.eup %2750 }
 0x86f   : > { %1574 = vmatmul.mubr.bf16.gmra.mrb[48].mxu1 %v1521_v18  ;;  %v1514_v58 = vmul.f32 %v2751_v54, %v3377_v61  ;;  %v1513_v39 = vmul.f32 %v2751_v54, %v3375_v27  ;;  %v3423_v27 = vld [vmem:[%s3739_s6 + $0x8] sm:$0xff]  }
 0x870   : > { %v2753_v29 = vpop.eup %2752 }
 0x871   : > { %v1516_v59 = vmul.f32 %v2753_v29, %v3383_v9  ;;  %v1515_v8 = vmul.f32 %v2753_v29, %v3379_v62 }
 0x873   : > { %v1524_v51 = vpack.c.bf16 %v1516_v59, %v1514_v58  ;;  %v1523_v46 = vpack.c.bf16 %v1515_v8, %v1513_v39 }
 0x875   : > { %1581 = vmatprep.mubr.bf16.mxu1 %v1524_v51 }
 0x877   : > { %1582 = vmatmul.mubr.bf16.gmra.mrb[52].mxu1 %v1523_v46 }
 0x878   : > { %1723 = vmatprep.mubr.bf16.mxu1 %v2869_v33 }
 0x883   : > { %v891_v38 = vpop.trf.xlu0 }
 0x887   : > { %v892_v50 = vpop.trf.xlu0 }
 0x888   : > { %v915_v41 = vpack.c.bf16 %v892_v50, %v891_v38 }
 0x88a   : > { %2513 = vmatmul.mubr.msk.bf16.vlgmr.msra.gmra.mrb[56].mxu1 %vm718_vm10, %v915_v41 }
 0x88b   : > { %2581 = vmatpush3.bf16.xpose.msra.mxu1 %v3061_v0  ;;  %v893_v61 = vpop.trf.xlu0  ;;  %1733 = vmatprep.mubr.bf16.mxu1 %v2869_v33 }
 0x88c   : > { %2609 = vmatprep.subr.msk.bf16.mxu1 %vm718_vm10, %v3423_v27 }
 0x88f   : > { %v894_v62 = vpop.trf.xlu0 }
 0x890   : > { %v916_v9 = vpack.c.bf16 %v894_v62, %v893_v61 }
 0x892   : > { %2514 = vmatmul.mubr.msk.bf16.gmra.mrb[60].mxu1 %vm718_vm10, %v916_v9 }
 0x893   : > { %2583 = vmatpush3.bf16.xpose.msra.mxu1 %v3075_v5  ;;  %v895_v60 = vpop.trf.xlu0  ;;  %1743 = vmatprep.mubr.bf16.mxu1 %v2869_v33 }
 0x894   : > { %2259 = vmatprep.subr.bf16.mxu1 %v3202_v11 }
 0x897   : > { %v896_v6 = vpop.trf.xlu0 }
 0x898   : > { %v917_v3 = vpack.c.bf16 %v896_v6, %v895_v60 }
 0x89a   : > { %2515 = vmatmul.mubr.msk.bf16.gmra.mrb[64].mxu1 %vm718_vm10, %v917_v3 }
 0x89b   : > { %v897_v4 = vpop.trf.xlu0  ;;  %1753 = vmatprep.mubr.bf16.mxu1 %v2869_v33 }
 0x89f   : > { %v898_v24 = vpop.trf.xlu0 }
 0x8a0   : > { %v918_v2 = vpack.c.bf16 %v898_v24, %v897_v4 }
 0x8a2   : > { %2516 = vmatmul.mubr.msk.bf16.gmra.mrb[68].mxu1 %vm718_vm10, %v918_v2 }
 0x932   : > { %v1559_v42 = vpop.f32.mrb[40].mxu1 }
 0x933   : > { %v1561_v43 = vpop.f32.mrb[41].mxu1 }
 0x934   : > { %v1562_v17 = vpop.f32.mrb[42].mxu1 }
 0x935   : > { %v1590_v20 = vpack.c.bf16 %v1562_v17, %v1559_v42  ;;  %v1564_v52 = vpop.f32.mrb[43].mxu1 }
 0x937   : > { %2572 = vmatprep.mubr.msk.bf16.mxu0 %vm718_vm10, %v1590_v20 }
 0x93a   : > { %v1567_v22 = vpop.f32.mrb[44].mxu1 }
 0x93b   : > { %v1569_v11 = vpop.f32.mrb[45].mxu1 }
 0x93c   : > { %v1570_v23 = vpop.f32.mrb[46].mxu1 }
 0x93d   : > { %v1591_v25 = vpack.c.bf16 %v1570_v23, %v1567_v22  ;;  %v1572_v28 = vpop.f32.mrb[47].mxu1 }
 0x93f   : > { %2573 = vmatmul.mubr.msk.bf16.vlgmr.msra.gmra.mrb[48].mxu0 %vm718_vm10, %v1591_v25 }
 0x940   : > { %1893 = vmatpush1.bf16.xpose.msra.mxu0 %v3200_v55 }
 0x941   : > { %1894 = vmatprep.subr.bf16.mxu0 %v3232_v35 }
 0x942   : > { %v1575_v30 = vpop.f32.mrb[48].mxu1 }
 0x943   : > { %v1577_v31 = vpop.f32.mrb[49].mxu1 }
 0x944   : > { %v1578_v49 = vpop.f32.mrb[50].mxu1 }
 0x945   : > { %v1592_v48 = vpack.c.bf16 %v1578_v49, %v1575_v30  ;;  %v1580_v40 = vpop.f32.mrb[51].mxu1 }
 0x947   : > { %2576 = vmatprep.mubr.msk.bf16.mxu0 %vm718_vm10, %v1592_v48 }
 0x948   : > { %1895 = vmatpush1.bf16.xpose.msra.mxu0 %v3230_v32 }
 0x949   : > { %2058 = vmatprep.subr.bf16.mxu0 %v3033_v45 }
 0x94a   : > { %v1583_v12 = vpop.f32.mrb[52].mxu1 }
 0x94b   : > { %v1585_v34 = vpop.f32.mrb[53].mxu1 }
 0x94c   : > { %v1586_v26 = vpop.f32.mrb[54].mxu1 }
 0x94d   : > { %v1593_v53 = vpack.c.bf16 %v1586_v26, %v1583_v12  ;;  %v1588_v7 = vpop.f32.mrb[55].mxu1 }
 0x94f   : > { %2577 = vmatmul.mubr.msk.bf16.gmra.mrb[52].mxu0 %vm718_vm10, %v1593_v53 }
 0x95d   : > { %v1725_v36 = vpop.f32.mrb[56].mxu1 }
 0x95e   : > { %v1727_v37 = vpop.f32.mrb[57].mxu1 }
 0x95f   : > { %v1729_v15 = vpop.f32.mrb[58].mxu1  ;;  %v1764_v19 = vmax.f32 %v1725_v36, %v1727_v37 }
 0x960   : > { %v1731_v21 = vpop.f32.mrb[59].mxu1 }
 0x961   : > { %1765 = vmax.xlane.f32.xlu1 %v1764_v19  ;;  %v1767_v63 = vmax.f32 %v1729_v15, %v1731_v21 }
 0x965   : > { %1768 = vmax.xlane.f32.xlu1 %v1767_v63  ;;  %v1735_v16 = vpop.f32.mrb[60].mxu1 }
 0x966   : > { %v1737_v14 = vpop.f32.mrb[61].mxu1 }
 0x967   : > { %v1739_v1 = vpop.f32.mrb[62].mxu1  ;;  %v1770_v10 = vmax.f32 %v1735_v16, %v1737_v14 }
 0x968   : > { %v1741_v45 = vpop.f32.mrb[63].mxu1 }
 0x969   : > { %1771 = vmax.xlane.f32.xlu1 %v1770_v10  ;;  %v1773_v47 = vmax.f32 %v1739_v1, %v1741_v45 }
 0x96d   : > { %1774 = vmax.xlane.f32.xlu1 %v1773_v47  ;;  %v1745_v18 = vpop.f32.mrb[64].mxu1 }
 0x96e   : > { %v1747_v54 = vpop.f32.mrb[65].mxu1 }
 0x96f   : > { %v1749_v29 = vpop.f32.mrb[66].mxu1  ;;  %v1776_v58 = vmax.f32 %v1745_v18, %v1747_v54 }
 0x970   : > { %v1751_v59 = vpop.f32.mrb[67].mxu1 }
 0x971   : > { %1777 = vmax.xlane.f32.xlu1 %v1776_v58  ;;  %v1779_v39 = vmax.f32 %v1749_v29, %v1751_v59 }
 0x975   : > { %1780 = vmax.xlane.f32.xlu1 %v1779_v39  ;;  %v3442_v8 = vpop.f32.mrb[68].mxu1 }
 0x976   : > { %v3444_v51 = vpop.f32.mrb[69].mxu1 }
 0x977   : > { %v3446_v46 = vpop.f32.mrb[70].mxu1  ;;  %v1782_v38 = vmax.f32 %v3442_v8, %v3444_v51 }
 0x978   : > { %v3450_v50 = vpop.f32.mrb[71].mxu1 }
 0x979   : > { %v1785_v41 = vmax.f32 %v3446_v46, %v3450_v50  ;;  %1783 = vmax.xlane.f32.xlu1 %v1782_v38 }
 0x97d   : > { %1786 = vmax.xlane.f32.xlu1 %v1785_v41 }
 0x9ee   : > { %v1766_v61 = vpop.xlane.xlu1 %1765 }
 0x9ef   : > { %v1788_v62 = vsub.f32 %v1725_v36, %v1766_v61  ;;  %v1789_v9 = vsub.f32 %v1727_v37, %v1766_v61 }
 0x9f1   : > { %v1804_v60 = vmul.f32 1.442695, %v1788_v62  ;;  %v1806_v6 = vmul.f32 1.442695, %v1789_v9 }
 0x9f2   : > { %v1769_v3 = vpop.xlane.xlu1 %1768 }
 0x9f3   : > { %2754 = vpow2.f32 %v1804_v60  ;;  %v1790_v4 = vsub.f32 %v1729_v15, %v1769_v3  ;;  %v1791_v24 = vsub.f32 %v1731_v21, %v1769_v3 }
 0x9f4   : > { %2756 = vpow2.f32 %v1806_v6 }
 0x9f5   : > { %v1808_v2 = vmul.f32 1.442695, %v1790_v4  ;;  %v1810_v42 = vmul.f32 1.442695, %v1791_v24 }
 0x9f6   : > { %v1772_v43 = vpop.xlane.xlu1 %1771 }
 0x9f7   : > { %2758 = vpow2.f32 %v1808_v2  ;;  %v1792_v17 = vsub.f32 %v1735_v16, %v1772_v43  ;;  %v1793_v20 = vsub.f32 %v1737_v14, %v1772_v43 }
 0x9f8   : > { %2760 = vpow2.f32 %v1810_v42 }
 0x9f9   : > { %v1812_v52 = vmul.f32 1.442695, %v1792_v17  ;;  %v1814_v22 = vmul.f32 1.442695, %v1793_v20 }
 0x9fa   : > { %v1775_v11 = vpop.xlane.xlu1 %1774 }
 0x9fb   : > { %2762 = vpow2.f32 %v1812_v52  ;;  %v1794_v23 = vsub.f32 %v1739_v1, %v1775_v11  ;;  %v1795_v25 = vsub.f32 %v1741_v45, %v1775_v11 }
 0x9fc   : > { %2764 = vpow2.f32 %v1814_v22 }
 0x9fd   : > { %v3454_v28 = vpop.eup %2754  ;;  %v1816_v30 = vmul.f32 1.442695, %v1794_v23  ;;  %v1818_v31 = vmul.f32 1.442695, %v1795_v25 }
 0x9fe   : > { %v3456_v49 = vpop.eup %2756  ;;  %v1778_v48 = vpop.xlane.xlu1 %1777 }
 0x9ff   : > { %2766 = vpow2.f32 %v1816_v30  ;;  %v1796_v40 = vsub.f32 %v1745_v18, %v1778_v48  ;;  %v1797_v12 = vsub.f32 %v1747_v54, %v1778_v48  ;;  %v1836_v34 = vadd.f32 %v3456_v49, %v3454_v28 }
 0xa00   : > { %2768 = vpow2.f32 %v1818_v31 }
 0xa01   : > { %v3460_v26 = vpop.eup %2758  ;;  %v1820_v53 = vmul.f32 1.442695, %v1796_v40  ;;  %v1822_v7 = vmul.f32 1.442695, %v1797_v12  ;;  %1837 = vadd.xlane.f32.xlu1 %v1836_v34 }
 0xa02   : > { %v3462_v36 = vpop.eup %2760  ;;  %v1781_v37 = vpop.xlane.xlu1 %1780 }
 0xa03   : > { %2770 = vpow2.f32 %v1820_v53  ;;  %v1798_v15 = vsub.f32 %v1749_v29, %v1781_v37  ;;  %v1799_v19 = vsub.f32 %v1751_v59, %v1781_v37  ;;  %v1839_v21 = vadd.f32 %v3462_v36, %v3460_v26 }
 0xa04   : > { %2772 = vpow2.f32 %v1822_v7 }
 0xa05   : > { %v3466_v63 = vpop.eup %2762  ;;  %v1824_v16 = vmul.f32 1.442695, %v1798_v15  ;;  %v1826_v14 = vmul.f32 1.442695, %v1799_v19  ;;  %1840 = vadd.xlane.f32.xlu1 %v1839_v21  ;;  %v3530_v15 = vpop.trf.xlu0 }
 0xa06   : > { %v3468_v1 = vpop.eup %2764  ;;  %v1784_v10 = vpop.xlane.xlu1 %1783 }
 0xa07   : > { %2774 = vpow2.f32 %v1824_v16  ;;  %v1800_v45 = vsub.f32 %v3442_v8, %v1784_v10  ;;  %v1801_v47 = vsub.f32 %v3444_v51, %v1784_v10  ;;  %v1842_v18 = vadd.f32 %v3468_v1, %v3466_v63 }
 0xa08   : > { %2776 = vpow2.f32 %v1826_v14 }
 0xa09   : > { %v3474_v54 = vpop.eup %2766  ;;  %v1828_v29 = vmul.f32 1.442695, %v1800_v45  ;;  %v1830_v58 = vmul.f32 1.442695, %v1801_v47  ;;  %1843 = vadd.xlane.f32.xlu1 %v1842_v18  ;;  %v3532_v19 = vpop.trf.xlu0 }
 0xa0a   : > { %v3476_v59 = vpop.eup %2768  ;;  %v1787_v39 = vpop.xlane.xlu1 %1786 }
 0xa0b   : > { %2778 = vpow2.f32 %v1828_v29  ;;  %v1802_v38 = vsub.f32 %v3446_v46, %v1787_v39  ;;  %v1803_v41 = vsub.f32 %v3450_v50, %v1787_v39  ;;  %v1845_v8 = vadd.f32 %v3476_v59, %v3474_v54 }
 0xa0c   : > { %2780 = vpow2.f32 %v1830_v58 }
 0xa0d   : > { %v3482_v51 = vpop.eup %2770  ;;  %v1832_v61 = vmul.f32 1.442695, %v1802_v38  ;;  %v1834_v62 = vmul.f32 1.442695, %v1803_v41  ;;  %1846 = vadd.xlane.f32.xlu1 %v1845_v8  ;;  %v3534_v21 = vpop.trf.xlu0 }
 0xa0e   : > { %v3484_v9 = vpop.eup %2772 }
 0xa0f   : > { %2782 = vpow2.f32 %v1832_v61  ;;  %v1848_v60 = vadd.f32 %v3484_v9, %v3482_v51 }
 0xa10   : > { %2784 = vpow2.f32 %v1834_v62 }
 0xa11   : > { %v3488_v46 = vpop.eup %2774  ;;  %1849 = vadd.xlane.f32.xlu1 %v1848_v60  ;;  %v3536_v16 = vpop.trf.xlu0 }
 0xa12   : > { %v3490_v50 = vpop.eup %2776  ;;  %v2574_v6 = vpop.f32.mrb[48].mxu0 }
 0xa13   : > { %v1649_v3 = vadd.f32 %v2574_v6, %v3292_v13  ;;  %v1640_v4 = vpop.f32.mrb[49].mxu0  ;;  %v1851_v24 = vadd.f32 %v3490_v50, %v3488_v46 }
 0xa14   : > { %v1641_v2 = vadd.f32 %v3292_v13, %v1640_v4  ;;  %v2575_v42 = vpop.f32.mrb[50].mxu0 }
 0xa15   : > { %v3496_v43 = vpop.eup %2778  ;;  %1673 = vst.msk [vmem:[%s3297_s20 + $0x50] sm:$0xff] %vm718_vm10, %v1649_v3  ;;  %v1652_v17 = vadd.f32 %v2575_v42, %v3292_v13  ;;  %v1643_v20 = vpop.f32.mrb[51].mxu0  ;;  %1852 = vadd.xlane.f32.xlu1 %v1851_v24 }
 0xa16   : > { %v3501_v52 = vpop.eup %2780  ;;  %1671 = vst.msk [vmem:[%s3297_s20 + $0x40] sm:$0xff] %vm718_vm10, %v1641_v2  ;;  %v1644_v22 = vadd.f32 %v3292_v13, %v1643_v20  ;;  %v3538_v10 = vpop.trf.xlu0 }
 0xa17   : > { %1674 = vst.msk [vmem:[%s3297_s20 + $0x58] sm:$0xff] %vm718_vm10, %v1652_v17  ;;  %v1854_v11 = vadd.f32 %v3501_v52, %v3496_v43 }
 0xa18   : > { %1672 = vst.msk [vmem:[%s3297_s20 + $0x48] sm:$0xff] %vm718_vm10, %v1644_v22 }
 0xa19   : > { %v3512_v23 = vpop.eup %2782  ;;  %1855 = vadd.xlane.f32.xlu0 %v1854_v11 }
 0xa1a   : > { %v3514_v25 = vpop.eup %2784  ;;  %v3540_v47 = vpop.trf.xlu0 }
 0xa1b   : > { %v1857_v30 = vadd.f32 %v3514_v25, %v3512_v23 }
 0xa1d   : > { %1858 = vadd.xlane.f32.xlu1 %v1857_v30 }
 0xa1e   : > { %v3542_v29 = vpop.trf.xlu0 }
 0xa22   : > { %v2578_v31 = vpop.f32.mrb[52].mxu0  ;;  %v906_v60 = vpop.trf.xlu0 }
 0xa23   : > { %v1665_v48 = vadd.f32 %v2578_v31, %v3292_v13  ;;  %v1656_v40 = vpop.f32.mrb[53].mxu0 }
 0xa24   : > { %v1657_v12 = vadd.f32 %v3292_v13, %v1656_v40  ;;  %v2579_v34 = vpop.f32.mrb[54].mxu0 }
 0xa25   : > { %1677 = vst.msk [vmem:[%s3297_s20 + $0x70] sm:$0xff] %vm718_vm10, %v1665_v48  ;;  %v1668_v53 = vadd.f32 %v2579_v34, %v3292_v13  ;;  %v1659_v7 = vpop.f32.mrb[55].mxu0 }
 0xa26   : > { %1675 = vst.msk [vmem:[%s3297_s20 + $0x60] sm:$0xff] %vm718_vm10, %v1657_v12  ;;  %v1660_v37 = vadd.f32 %v3292_v13, %v1659_v7 }
 0xa27   : > { %1678 = vst.msk [vmem:[%s3297_s20 + $0x78] sm:$0xff] %vm718_vm10, %v1668_v53 }
 0xa28   : > { %1676 = vst.msk [vmem:[%s3297_s20 + $0x68] sm:$0xff] %vm718_vm10, %v1660_v37 }
 0xa8e   : > { %v1838_v14 = vpop.xlane.xlu1 %1837 }
 0xa8f   : > { %2786 = vrcp.f32 %v1838_v14 }
 0xa92   : > { %v1841_v45 = vpop.xlane.xlu1 %1840 }
 0xa93   : > { %2788 = vrcp.f32 %v1841_v45 }
 0xa96   : > { %v1844_v13 = vpop.xlane.xlu1 %1843 }
 0xa97   : > { %2790 = vrcp.f32 %v1844_v13 }
 0xa99   : > { %v2787_v58 = vpop.eup %2786 }
 0xa9a   : > { %v1847_v18 = vpop.xlane.xlu1 %1846  ;;  %v1868_v38 = vmul.f32 %v2787_v58, %v3454_v28  ;;  %v1869_v61 = vmul.f32 %v2787_v58, %v3456_v49 }
 0xa9b   : > { %2792 = vrcp.f32 %v1847_v18 }
 0xa9d   : > { %v2789_v39 = vpop.eup %2788 }
 0xa9e   : > { %v1870_v41 = vmul.f32 %v2789_v39, %v3460_v26  ;;  %v1850_v8 = vpop.xlane.xlu1 %1849  ;;  %v1871_v62 = vmul.f32 %v2789_v39, %v3462_v36 }
 0xa9f   : > { %2794 = vrcp.f32 %v1850_v8 }
 0xaa0   : > { %v1885_v6 = vpack.c.bf16 %v1871_v62, %v1869_v61  ;;  %v1884_v3 = vpack.c.bf16 %v1870_v41, %v1868_v38 }
 0xaa1   : > { %v2791_v24 = vpop.eup %2790 }
 0xaa2   : > { %1924 = vmatprep.mubr.bf16.mxu0 %v1885_v6  ;;  %v1853_v4 = vpop.xlane.xlu1 %1852  ;;  %v1873_v26 = vmul.f32 %v2791_v24, %v3468_v1  ;;  %v1872_v36 = vmul.f32 %v2791_v24, %v3466_v63 }
 0xaa3   : > { %2796 = vrcp.f32 %v1853_v4  ;;  %1925 = vmatmul.mubr.bf16.vlgmr.msra.gmra.mrb[56].mxu0 %v1884_v3 }
 0xaa4   : > { %2059 = vmatpush1.bf16.msra.mxu0 %v3031_v44  ;;  %v2851_v44 = vld [vmem:[%s3739_s6] sm:$0xff]  }
 0xaa5   : > { %v2793_v2 = vpop.eup %2792  ;;  %2060 = vmatprep.subr.bf16.mxu0 %v3039_v57 }
 0xaa6   : > { %v1856_v28 = vpop.xlane.xlu0 %1855  ;;  %v1875_v49 = vmul.f32 %v2793_v2, %v3476_v59  ;;  %v1874_v42 = vmul.f32 %v2793_v2, %v3474_v54 }
 0xaa7   : > { %2798 = vrcp.f32 %v1856_v28 }
 0xaa8   : > { %2061 = vmatpush1.bf16.msra.mxu0 %v3037_v56  ;;  %v1887_v17 = vpack.c.bf16 %v1875_v49, %v1873_v26  ;;  %v1886_v20 = vpack.c.bf16 %v1874_v42, %v1872_v36 }
 0xaa9   : > { %2610 = vmatprep.subr.msk.bf16.mxu0 %vm718_vm10, %v2851_v44  ;;  %v2795_v1 = vpop.eup %2794 }
 0xaaa   : > { %1932 = vmatprep.mubr.bf16.mxu0 %v1887_v17  ;;  %v1859_v57 = vpop.xlane.xlu1 %1858  ;;  %v1877_v63 = vmul.f32 %v2795_v1, %v3484_v9  ;;  %v1876_v56 = vmul.f32 %v2795_v1, %v3482_v51  ;;  %v919_v51 = vpack.c.bf16 %v3532_v19, %v3530_v15 }
 0xaab   : > { %2800 = vrcp.f32 %v1859_v57  ;;  %1933 = vmatmul.mubr.bf16.gmra.mrb[60].mxu0 %v1886_v20 }
 0xaad   : > { %v2797_v59 = vpop.eup %2796 }
 0xaae   : > { %v1879_v54 = vmul.f32 %v2797_v59, %v3490_v50  ;;  %v1878_v22 = vmul.f32 %v2797_v59, %v3488_v46  ;;  %v920_v46 = vpack.c.bf16 %v3536_v16, %v3534_v21 }
 0xab0   : > { %v1889_v11 = vpack.c.bf16 %v1879_v54, %v1877_v63  ;;  %v1888_v30 = vpack.c.bf16 %v1878_v22, %v1876_v56 }
 0xab1   : > { %v2799_v31 = vpop.eup %2798 }
 0xab2   : > { %1940 = vmatprep.mubr.bf16.mxu0 %v1889_v11  ;;  %v1881_v40 = vmul.f32 %v2799_v31, %v3501_v52  ;;  %v1880_v34 = vmul.f32 %v2799_v31, %v3496_v43  ;;  %v921_v43 = vpack.c.bf16 %v3540_v47, %v3538_v10 }
 0xab3   : > { %1941 = vmatmul.mubr.bf16.gmra.mrb[64].mxu0 %v1888_v30 }
 0xab5   : > { %v2801_v48 = vpop.eup %2800 }
 0xab6   : > { %v1883_v12 = vmul.f32 %v2801_v48, %v3514_v25  ;;  %v1882_v9 = vmul.f32 %v2801_v48, %v3512_v23 }
 0xab8   : > { %v1891_v53 = vpack.c.bf16 %v1883_v12, %v1881_v40  ;;  %v1890_v50 = vpack.c.bf16 %v1882_v9, %v1880_v34 }
 0xaba   : > { %1948 = vmatprep.mubr.bf16.mxu0 %v1891_v53 }
 0xabb   : > { %1949 = vmatmul.mubr.bf16.gmra.mrb[68].mxu0 %v1890_v50 }
 0xabc   : > { %2090 = vmatprep.mubr.bf16.mxu0 %v2869_v33 }
 0xac3   : > { %2521 = vmatmul.mubr.msk.bf16.vlgmr.msra.gmra.mrb[72].mxu0 %vm718_vm10, %v919_v51 }
 0xac4   : > { %2100 = vmatprep.mubr.bf16.mxu0 %v2869_v33  ;;  %2593 = vmatpush3.bf16.xpose.msra.mxu0 %v3061_v0  ;;  %v922_v0 = vpack.c.bf16 %v906_v60, %v3542_v29 }
 0xac5   : > { %2611 = vmatprep.subr.msk.bf16.mxu0 %vm718_vm10, %v3423_v27 }
 0xacb   : > { %2522 = vmatmul.mubr.msk.bf16.gmra.mrb[76].mxu0 %vm718_vm10, %v920_v46 }
 0xacc   : > { %2110 = vmatprep.mubr.bf16.mxu0 %v2869_v33  ;;  %2595 = vmatpush3.bf16.xpose.msra.mxu0 %v3075_v5 }
 0xad3   : > { %2523 = vmatmul.mubr.msk.bf16.gmra.mrb[80].mxu0 %vm718_vm10, %v921_v43 }
 0xad4   : > { %2120 = vmatprep.mubr.bf16.mxu0 %v2869_v33 }
 0xadb   : > { %2524 = vmatmul.mubr.msk.bf16.gmra.mrb[84].mxu0 %vm718_vm10, %v922_v0 }
 0xb76   : > { %v1926_v27 = vpop.f32.mrb[56].mxu0 }
 0xb77   : > { %v1928_v52 = vpop.f32.mrb[57].mxu0 }
 0xb78   : > { %v1929_v23 = vpop.f32.mrb[58].mxu0 }
 0xb79   : > { %v1957_v25 = vpack.c.bf16 %v1929_v23, %v1926_v27  ;;  %v1931_v7 = vpop.f32.mrb[59].mxu0 }
 0xb7b   : > { %2584 = vmatprep.mubr.msk.bf16.mxu1 %vm718_vm10, %v1957_v25 }
 0xb7e   : > { %v1934_v37 = vpop.f32.mrb[60].mxu0 }
 0xb7f   : > { %v1936_v5 = vpop.f32.mrb[61].mxu0 }
 0xb80   : > { %v1937_v15 = vpop.f32.mrb[62].mxu0 }
 0xb81   : > { %v1958_v19 = vpack.c.bf16 %v1937_v15, %v1934_v37  ;;  %v1939_v21 = vpop.f32.mrb[63].mxu0 }
 0xb83   : > { %2585 = vmatmul.mubr.msk.bf16.vlgmr.msra.gmra.mrb[72].mxu1 %vm718_vm10, %v1958_v19 }
 0xb84   : > { %2260 = vmatpush1.bf16.xpose.msra.mxu1 %v3200_v55 }
 0xb85   : > { %2261 = vmatprep.subr.bf16.mxu1 %v3232_v35 }
 0xb86   : > { %v1942_v33 = vpop.f32.mrb[64].mxu0 }
 0xb87   : > { %v1944_v16 = vpop.f32.mrb[65].mxu0 }
 0xb88   : > { %v1945_v14 = vpop.f32.mrb[66].mxu0 }
 0xb89   : > { %v1959_v10 = vpack.c.bf16 %v1945_v14, %v1942_v33  ;;  %v1947_v45 = vpop.f32.mrb[67].mxu0 }
 0xb8b   : > { %2588 = vmatprep.mubr.msk.bf16.mxu1 %vm718_vm10, %v1959_v10 }
 0xb8c   : > { %2262 = vmatpush1.bf16.xpose.msra.mxu1 %v3230_v32 }
 0xb8e   : > { %v1950_v47 = vpop.f32.mrb[68].mxu0 }
 0xb8f   : > { %v1952_v13 = vpop.f32.mrb[69].mxu0 }
 0xb90   : > { %v1953_v18 = vpop.f32.mrb[70].mxu0 }
 0xb91   : > { %v1960_v29 = vpack.c.bf16 %v1953_v18, %v1950_v47  ;;  %v1955_v58 = vpop.f32.mrb[71].mxu0 }
 0xb93   : > { %2589 = vmatmul.mubr.msk.bf16.gmra.mrb[76].mxu1 %vm718_vm10, %v1960_v29 }
 0xb96   : > { %v2092_v39 = vpop.f32.mrb[72].mxu0 }
 0xb97   : > { %v2094_v55 = vpop.f32.mrb[73].mxu0 }
 0xb98   : > { %v2131_v38 = vmax.f32 %v2092_v39, %v2094_v55  ;;  %v2096_v35 = vpop.f32.mrb[74].mxu0 }
 0xb99   : > { %v2098_v41 = vpop.f32.mrb[75].mxu0 }
 0xb9a   : > { %v2134_v8 = vmax.f32 %v2096_v35, %v2098_v41  ;;  %2132 = vmax.xlane.f32.xlu1 %v2131_v38 }
 0xb9e   : > { %2135 = vmax.xlane.f32.xlu1 %v2134_v8  ;;  %v2102_v61 = vpop.f32.mrb[76].mxu0 }
 0xb9f   : > { %v2104_v62 = vpop.f32.mrb[77].mxu0 }
 0xba0   : > { %v2137_v60 = vmax.f32 %v2102_v61, %v2104_v62  ;;  %v2106_v6 = vpop.f32.mrb[78].mxu0 }
 0xba1   : > { %v2108_v32 = vpop.f32.mrb[79].mxu0 }
 0xba2   : > { %v2140_v3 = vmax.f32 %v2106_v6, %v2108_v32  ;;  %2138 = vmax.xlane.f32.xlu1 %v2137_v60 }
 0xba6   : > { %2141 = vmax.xlane.f32.xlu1 %v2140_v3  ;;  %v2112_v4 = vpop.f32.mrb[80].mxu0 }
 0xba7   : > { %v2114_v24 = vpop.f32.mrb[81].mxu0 }
 0xba8   : > { %v2143_v2 = vmax.f32 %v2112_v4, %v2114_v24  ;;  %v2116_v28 = vpop.f32.mrb[82].mxu0 }
 0xba9   : > { %v2118_v26 = vpop.f32.mrb[83].mxu0 }
 0xbaa   : > { %v2146_v49 = vmax.f32 %v2116_v28, %v2118_v26  ;;  %2144 = vmax.xlane.f32.xlu1 %v2143_v2 }
 0xbae   : > { %2147 = vmax.xlane.f32.xlu1 %v2146_v49  ;;  %v3593_v36 = vpop.f32.mrb[84].mxu0 }
 0xbaf   : > { %v3595_v42 = vpop.f32.mrb[85].mxu0 }
 0xbb0   : > { %v2149_v17 = vmax.f32 %v3593_v36, %v3595_v42  ;;  %v3599_v20 = vpop.f32.mrb[86].mxu0 }
 0xbb1   : > { %v3601_v44 = vpop.f32.mrb[87].mxu0 }
 0xbb2   : > { %v2152_v57 = vmax.f32 %v3599_v20, %v3601_v44  ;;  %2150 = vmax.xlane.f32.xlu1 %v2149_v17 }
 0xbb6   : > { %2153 = vmax.xlane.f32.xlu1 %v2152_v57 }
 0xc27   : > { %v2133_v1 = vpop.xlane.xlu1 %2132 }
 0xc28   : > { %v2155_v59 = vsub.f32 %v2092_v39, %v2133_v1  ;;  %v2156_v63 = vsub.f32 %v2094_v55, %v2133_v1 }
 0xc2a   : > { %v2171_v54 = vmul.f32 1.442695, %v2155_v59  ;;  %v2173_v56 = vmul.f32 1.442695, %v2156_v63  ;;  %v3660_v59 = vld [vmem:[%s3740_s7] ss:$0 sm:$0xff] }
 0xc2b   : > { %v2136_v22 = vpop.xlane.xlu1 %2135 }
 0xc2c   : > { %2802 = vpow2.f32 %v2171_v54  ;;  %v2157_v11 = vsub.f32 %v2096_v35, %v2136_v22  ;;  %v2158_v30 = vsub.f32 %v2098_v41, %v2136_v22 }
 0xc2d   : > { %2804 = vpow2.f32 %v2173_v56 }
 0xc2e   : > { %v2175_v31 = vmul.f32 1.442695, %v2157_v11  ;;  %v2177_v48 = vmul.f32 1.442695, %v2158_v30 }
 0xc2f   : > { %v2139_v40 = vpop.xlane.xlu1 %2138 }
 0xc30   : > { %2806 = vpow2.f32 %v2175_v31  ;;  %v2159_v12 = vsub.f32 %v2102_v61, %v2139_v40  ;;  %v2160_v34 = vsub.f32 %v2104_v62, %v2139_v40 }
 0xc31   : > { %2808 = vpow2.f32 %v2177_v48 }
 0xc32   : > { %v2179_v9 = vmul.f32 1.442695, %v2159_v12  ;;  %v2181_v53 = vmul.f32 1.442695, %v2160_v34 }
 0xc33   : > { %v2142_v50 = vpop.xlane.xlu1 %2141 }
 0xc34   : > { %2810 = vpow2.f32 %v2179_v9  ;;  %v2161_v51 = vsub.f32 %v2106_v6, %v2142_v50  ;;  %v2162_v46 = vsub.f32 %v2108_v32, %v2142_v50 }
 0xc35   : > { %2812 = vpow2.f32 %v2181_v53 }
 0xc36   : > { %v3605_v43 = vpop.eup %2802  ;;  %v2183_v0 = vmul.f32 1.442695, %v2161_v51  ;;  %v2185_v27 = vmul.f32 1.442695, %v2162_v46 }
 0xc37   : > { %v3607_v52 = vpop.eup %2804  ;;  %v2145_v23 = vpop.xlane.xlu1 %2144 }
 0xc38   : > { %2814 = vpow2.f32 %v2183_v0  ;;  %v2163_v25 = vsub.f32 %v2112_v4, %v2145_v23  ;;  %v2164_v7 = vsub.f32 %v2114_v24, %v2145_v23  ;;  %v2203_v37 = vadd.f32 %v3607_v52, %v3605_v43 }
 0xc39   : > { %2816 = vpow2.f32 %v2185_v27 }
 0xc3a   : > { %v3611_v5 = vpop.eup %2806  ;;  %v2187_v15 = vmul.f32 1.442695, %v2163_v25  ;;  %v2189_v19 = vmul.f32 1.442695, %v2164_v7  ;;  %2204 = vadd.xlane.f32.xlu1 %v2203_v37 }
 0xc3b   : > { %v3613_v21 = vpop.eup %2808  ;;  %v2148_v33 = vpop.xlane.xlu1 %2147 }
 0xc3c   : > { %2818 = vpow2.f32 %v2187_v15  ;;  %v2165_v16 = vsub.f32 %v2116_v28, %v2148_v33  ;;  %v2166_v14 = vsub.f32 %v2118_v26, %v2148_v33  ;;  %v2206_v10 = vadd.f32 %v3613_v21, %v3611_v5 }
 0xc3d   : > { %2820 = vpow2.f32 %v2189_v19 }
 0xc3e   : > { %v3617_v45 = vpop.eup %2810  ;;  %v2191_v47 = vmul.f32 1.442695, %v2165_v16  ;;  %v2193_v13 = vmul.f32 1.442695, %v2166_v14  ;;  %2207 = vadd.xlane.f32.xlu1 %v2206_v10 }
 0xc3f   : > { %v3619_v18 = vpop.eup %2812  ;;  %v2151_v29 = vpop.xlane.xlu1 %2150 }
 0xc40   : > { %2822 = vpow2.f32 %v2191_v47  ;;  %v2167_v58 = vsub.f32 %v3593_v36, %v2151_v29  ;;  %v2168_v39 = vsub.f32 %v3595_v42, %v2151_v29  ;;  %v2209_v55 = vadd.f32 %v3619_v18, %v3617_v45 }
 0xc41   : > { %2824 = vpow2.f32 %v2193_v13 }
 0xc42   : > { %v3625_v38 = vpop.eup %2814  ;;  %v2195_v35 = vmul.f32 1.442695, %v2167_v58  ;;  %v2197_v41 = vmul.f32 1.442695, %v2168_v39  ;;  %2210 = vadd.xlane.f32.xlu1 %v2209_v55 }
 0xc43   : > { %v3627_v8 = vpop.eup %2816  ;;  %v2154_v61 = vpop.xlane.xlu1 %2153 }
 0xc44   : > { %2826 = vpow2.f32 %v2195_v35  ;;  %v2169_v62 = vsub.f32 %v3599_v20, %v2154_v61  ;;  %v2170_v60 = vsub.f32 %v3601_v44, %v2154_v61  ;;  %v2212_v6 = vadd.f32 %v3627_v8, %v3625_v38 }
 0xc45   : > { %2828 = vpow2.f32 %v2197_v41 }
 0xc46   : > { %v3633_v32 = vpop.eup %2818  ;;  %v2199_v3 = vmul.f32 1.442695, %v2169_v62  ;;  %v2201_v4 = vmul.f32 1.442695, %v2170_v60  ;;  %2213 = vadd.xlane.f32.xlu1 %v2212_v6 }
 0xc47   : > { %v3635_v24 = vpop.eup %2820 }
 0xc48   : > { %2830 = vpow2.f32 %v2199_v3  ;;  %v2215_v2 = vadd.f32 %v3635_v24, %v3633_v32 }
 0xc49   : > { %2832 = vpow2.f32 %v2201_v4 }
 0xc4a   : > { %v3639_v28 = vpop.eup %2822  ;;  %2216 = vadd.xlane.f32.xlu1 %v2215_v2 }
 0xc4b   : > { %v3641_v26 = vpop.eup %2824 }
 0xc4c   : > { %v2218_v49 = vadd.f32 %v3641_v26, %v3639_v28 }
 0xc4e   : > { %v3645_v36 = vpop.eup %2826  ;;  %2219 = vadd.xlane.f32.xlu1 %v2218_v49 }
 0xc4f   : > { %v3647_v42 = vpop.eup %2828 }
 0xc50   : > { %v2221_v17 = vadd.f32 %v3647_v42, %v3645_v36 }
 0xc52   : > { %v3651_v20 = vpop.eup %2830  ;;  %2222 = vadd.xlane.f32.xlu1 %v2221_v17 }
 0xc53   : > { %v3653_v44 = vpop.eup %2832 }
 0xc54   : > { %v2224_v57 = vadd.f32 %v3653_v44, %v3651_v20 }
 0xc56   : > { %2225 = vadd.xlane.f32.xlu1 %v2224_v57  ;;  %v2586_v1 = vpop.f32.mrb[72].mxu1 }
 0xc57   : > { %v2016_v63 = vadd.f32 %v3660_v59, %v2586_v1  ;;  %v2007_v54 = vpop.f32.mrb[73].mxu1 }
 0xc58   : > { %v2008_v56 = vadd.f32 %v3660_v59, %v2007_v54  ;;  %v2587_v22 = vpop.f32.mrb[74].mxu1 }
 0xc59   : > { %2040 = vst.msk [vmem:[%s3297_s20 + $0x90] sm:$0xff] %vm718_vm10, %v2016_v63  ;;  %v2019_v11 = vadd.f32 %v3660_v59, %v2587_v22  ;;  %v2010_v30 = vpop.f32.mrb[75].mxu1 }
 0xc5a   : > { %2038 = vst.msk [vmem:[%s3297_s20 + $0x80] sm:$0xff] %vm718_vm10, %v2008_v56  ;;  %v2011_v31 = vadd.f32 %v3660_v59, %v2010_v30 }
 0xc5b   : > { %2041 = vst.msk [vmem:[%s3297_s20 + $0x98] sm:$0xff] %vm718_vm10, %v2019_v11 }
 0xc5c   : > { %2039 = vst.msk [vmem:[%s3297_s20 + $0x88] sm:$0xff] %vm718_vm10, %v2011_v31 }
 0xc66   : > { %v2590_v48 = vpop.f32.mrb[76].mxu1 }
 0xc67   : > { %v2032_v40 = vadd.f32 %v3660_v59, %v2590_v48  ;;  %v2023_v12 = vpop.f32.mrb[77].mxu1 }
 0xc68   : > { %v2024_v34 = vadd.f32 %v3660_v59, %v2023_v12  ;;  %v2591_v9 = vpop.f32.mrb[78].mxu1 }
 0xc69   : > { %2044 = vst.msk [vmem:[%s3297_s20 + $0xb0] sm:$0xff] %vm718_vm10, %v2032_v40  ;;  %v2035_v53 = vadd.f32 %v3660_v59, %v2591_v9  ;;  %v2026_v50 = vpop.f32.mrb[79].mxu1 }
 0xc6a   : > { %2042 = vst.msk [vmem:[%s3297_s20 + $0xa0] sm:$0xff] %vm718_vm10, %v2024_v34  ;;  %v2027_v51 = vadd.f32 %v3660_v59, %v2026_v50 }
 0xc6b   : > { %2045 = vst.msk [vmem:[%s3297_s20 + $0xb8] sm:$0xff] %vm718_vm10, %v2035_v53 }
 0xc6c   : > { %2043 = vst.msk [vmem:[%s3297_s20 + $0xa8] sm:$0xff] %vm718_vm10, %v2027_v51 }
 0xcc7   : > { %v2205_v46 = vpop.xlane.xlu1 %2204 }
 0xcc8   : > { %2834 = vrcp.f32 %v2205_v46 }
 0xccb   : > { %v2208_v0 = vpop.xlane.xlu1 %2207 }
 0xccc   : > { %2836 = vrcp.f32 %v2208_v0 }
 0xccf   : > { %v2211_v27 = vpop.xlane.xlu1 %2210 }
 0xcd0   : > { %2838 = vrcp.f32 %v2211_v27 }
 0xcd2   : > { %v2835_v25 = vpop.eup %2834 }
 0xcd3   : > { %v2214_v23 = vpop.xlane.xlu1 %2213  ;;  %v2235_v37 = vmul.f32 %v2835_v25, %v3605_v43  ;;  %v2236_v33 = vmul.f32 %v2835_v25, %v3607_v52 }
 0xcd4   : > { %2840 = vrcp.f32 %v2214_v23 }
 0xcd6   : > { %v2837_v7 = vpop.eup %2836 }
 0xcd7   : > { %v2237_v15 = vmul.f32 %v2837_v7, %v3611_v5  ;;  %v2217_v19 = vpop.xlane.xlu1 %2216  ;;  %v2238_v16 = vmul.f32 %v2837_v7, %v3613_v21 }
 0xcd8   : > { %2842 = vrcp.f32 %v2217_v19 }
 0xcd9   : > { %v2252_v14 = vpack.c.bf16 %v2238_v16, %v2236_v33  ;;  %v2251_v10 = vpack.c.bf16 %v2237_v15, %v2235_v37 }
 0xcda   : > { %v2839_v13 = vpop.eup %2838 }
 0xcdb   : > { %2291 = vmatprep.mubr.bf16.mxu1 %v2252_v14  ;;  %v2220_v47 = vpop.xlane.xlu1 %2219  ;;  %v2240_v39 = vmul.f32 %v2839_v13, %v3619_v18  ;;  %v2239_v5 = vmul.f32 %v2839_v13, %v3617_v45 }
 0xcdc   : > { %2844 = vrcp.f32 %v2220_v47  ;;  %2292 = vmatmul.mubr.bf16.vlgmr.msra.gmra.mrb[80].mxu1 %v2251_v10 }
 0xcde   : > { %v2841_v29 = vpop.eup %2840 }
 0xcdf   : > { %v2223_v58 = vpop.xlane.xlu1 %2222  ;;  %v2242_v43 = vmul.f32 %v2841_v29, %v3627_v8  ;;  %v2241_v52 = vmul.f32 %v2841_v29, %v3625_v38 }
 0xce0   : > { %2846 = vrcp.f32 %v2223_v58 }
 0xce1   : > { %v2254_v55 = vpack.c.bf16 %v2242_v43, %v2240_v39  ;;  %v2253_v21 = vpack.c.bf16 %v2241_v52, %v2239_v5 }
 0xce2   : > { %v2843_v41 = vpop.eup %2842 }
 0xce3   : > { %2299 = vmatprep.mubr.bf16.mxu1 %v2254_v55  ;;  %v2226_v35 = vpop.xlane.xlu1 %2225  ;;  %v2244_v62 = vmul.f32 %v2843_v41, %v3635_v24  ;;  %v2243_v18 = vmul.f32 %v2843_v41, %v3633_v32 }
 0xce4   : > { %2848 = vrcp.f32 %v2226_v35  ;;  %2300 = vmatmul.mubr.bf16.gmra.mrb[84].mxu1 %v2253_v21 }
 0xce6   : > { %v2845_v61 = vpop.eup %2844 }
 0xce7   : > { %v2246_v60 = vmul.f32 %v2845_v61, %v3641_v26  ;;  %v2245_v8 = vmul.f32 %v2845_v61, %v3639_v28 }
 0xce9   : > { %v2256_v45 = vpack.c.bf16 %v2246_v60, %v2244_v62  ;;  %v2255_v6 = vpack.c.bf16 %v2245_v8, %v2243_v18 }
 0xcea   : > { %v2847_v38 = vpop.eup %2846 }
 0xceb   : > { %2307 = vmatprep.mubr.bf16.mxu1 %v2256_v45  ;;  %v2248_v4 = vmul.f32 %v2847_v38, %v3647_v42  ;;  %v2247_v49 = vmul.f32 %v2847_v38, %v3645_v36 }
 0xcec   : > { %2308 = vmatmul.mubr.bf16.gmra.mrb[88].mxu1 %v2255_v6 }
 0xcee   : > { %v2849_v3 = vpop.eup %2848 }
 0xcef   : > { %v2250_v2 = vmul.f32 %v2849_v3, %v3653_v44  ;;  %v2249_v24 = vmul.f32 %v2849_v3, %v3651_v20 }
 0xcf1   : > { %v2258_v17 = vpack.c.bf16 %v2250_v2, %v2248_v4  ;;  %v2257_v26 = vpack.c.bf16 %v2249_v24, %v2247_v49 }
 0xcf3   : > { %2315 = vmatprep.mubr.bf16.mxu1 %v2258_v17 }
 0xcf4   : > { %2316 = vmatmul.mubr.bf16.gmra.mrb[92].mxu1 %v2257_v26 }
 0xdaf   : > { %v2293_v32 = vpop.f32.mrb[80].mxu1 }
 0xdb0   : > { %v2295_v28 = vpop.f32.mrb[81].mxu1 }
 0xdb1   : > { %v2296_v57 = vpop.f32.mrb[82].mxu1 }
 0xdb2   : > { %v2324_v1 = vpack.c.bf16 %v2296_v57, %v2293_v32  ;;  %v2298_v63 = vpop.f32.mrb[83].mxu1 }
 0xdb4   : > { %2596 = vmatprep.mubr.msk.bf16.mxu0 %vm718_vm10, %v2324_v1 }
 0xdb7   : > { %v2301_v54 = vpop.f32.mrb[84].mxu1 }
 0xdb8   : > { %v2303_v56 = vpop.f32.mrb[85].mxu1 }
 0xdb9   : > { %v2304_v42 = vpop.f32.mrb[86].mxu1 }
 0xdba   : > { %v2325_v22 = vpack.c.bf16 %v2304_v42, %v2301_v54  ;;  %v2306_v44 = vpop.f32.mrb[87].mxu1 }
 0xdbc   : > { %2597 = vmatmul.mubr.msk.bf16.vlgmr.msra.gmra.mrb[88].mxu0 %vm718_vm10, %v2325_v22 }
 0xdbf   : > { %v2309_v36 = vpop.f32.mrb[88].mxu1 }
 0xdc0   : > { %v2311_v20 = vpop.f32.mrb[89].mxu1 }
 0xdc1   : > { %v2312_v11 = vpop.f32.mrb[90].mxu1 }
 0xdc2   : > { %v2326_v30 = vpack.c.bf16 %v2312_v11, %v2309_v36  ;;  %v2314_v31 = vpop.f32.mrb[91].mxu1 }
 0xdc4   : > { %2600 = vmatprep.mubr.msk.bf16.mxu0 %vm718_vm10, %v2326_v30 }
 0xdc7   : > { %v2317_v48 = vpop.f32.mrb[92].mxu1 }
 0xdc8   : > { %v2319_v40 = vpop.f32.mrb[93].mxu1 }
 0xdc9   : > { %v2320_v12 = vpop.f32.mrb[94].mxu1 }
 0xdca   : > { %v2327_v34 = vpack.c.bf16 %v2320_v12, %v2317_v48  ;;  %v2322_v9 = vpop.f32.mrb[95].mxu1 }
 0xdcc   : > { %2601 = vmatmul.mubr.msk.bf16.gmra.mrb[92].mxu0 %vm718_vm10, %v2327_v34 }
 0xe8f   : > { %v2598_v53 = vpop.f32.mrb[88].mxu0 }
 0xe90   : > { %v2383_v50 = vadd.f32 %v3660_v59, %v2598_v53  ;;  %v2374_v51 = vpop.f32.mrb[89].mxu0 }
 0xe91   : > { %v2375_v46 = vadd.f32 %v3660_v59, %v2374_v51  ;;  %v2599_v0 = vpop.f32.mrb[90].mxu0 }
 0xe92   : > { %2407 = vst.msk [vmem:[%s3297_s20 + $0xd0] sm:$0xff] %vm718_vm10, %v2383_v50  ;;  %v2386_v27 = vadd.f32 %v3660_v59, %v2599_v0  ;;  %v2377_v23 = vpop.f32.mrb[91].mxu0 }
 0xe93   : > { %2405 = vst.msk [vmem:[%s3297_s20 + $0xc0] sm:$0xff] %vm718_vm10, %v2375_v46  ;;  %v2378_v25 = vadd.f32 %v3660_v59, %v2377_v23 }
 0xe94   : > { %2408 = vst.msk [vmem:[%s3297_s20 + $0xd8] sm:$0xff] %vm718_vm10, %v2386_v27 }
 0xe95   : > { %2406 = vst.msk [vmem:[%s3297_s20 + $0xc8] sm:$0xff] %vm718_vm10, %v2378_v25 }
 0xe9f   : > { %v2602_v7 = vpop.f32.mrb[92].mxu0 }
 0xea0   : > { %v2399_v37 = vadd.f32 %v3660_v59, %v2602_v7  ;;  %v2390_v15 = vpop.f32.mrb[93].mxu0 }
 0xea1   : > { %v2391_v19 = vadd.f32 %v3660_v59, %v2390_v15  ;;  %v2603_v33 = vpop.f32.mrb[94].mxu0 }
 0xea2   : > { %2411 = vst.msk [vmem:[%s3297_s20 + $0xf0] sm:$0xff] %vm718_vm10, %v2399_v37  ;;  %v2402_v16 = vadd.f32 %v3660_v59, %v2603_v33  ;;  %v2393_v14 = vpop.f32.mrb[95].mxu0 }
 0xea3   : > { %2409 = vst.msk [vmem:[%s3297_s20 + $0xe0] sm:$0xff] %vm718_vm10, %v2391_v19  ;;  %v2394_v10 = vadd.f32 %v3660_v59, %v2393_v14 }
 0xea4   : > { %2412 = vst.msk [vmem:[%s3297_s20 + $0xf8] sm:$0xff] %vm718_vm10, %v2402_v16 }
 0xea5   : > { %2410 = vst.msk [vmem:[%s3297_s20 + $0xe8] sm:$0xff] %vm718_vm10, %v2394_v10 }
 0xea6 PF: > { %s18_s27 = sadd.s32 1, %s2859_s27  }
 0xea7   : > { %p15_p4 = scmp.ge.s32.totalorder %s18_s27, 4  }
 0xea9   :  { %17 = sbr.rel (!%p15_p4) target bundleno = 1 (0x1), region = 83 }

</bundles_post_ra>
